<compile_context>
chip_gen: v7x
topology: tpu7x:2x2x1
jax: 0.10.0
libtpu: 0.0.40
codegen_flags: <defaults>
</compile_context>

<pallas_src>
import functools

import jax
import jax.numpy as jnp
from jax.experimental import pallas as pl
from jax.experimental.pallas import tpu as pltpu


def _round_up(x, m):
    return (x + m - 1) // m * m


def _pad2d(a, rows, cols):
    r, c = a.shape
    return jnp.pad(a, ((0, rows - r), (0, cols - c)))


def _vmem_capacity_bytes():
    try:
        return int(pltpu.get_tpu_info().vmem_capacity_bytes)
    except Exception:
        return 64 * 1024 * 1024      # conservative (v7x per-TC capacity)


def _tile_vmem_bytes(th, cin, cpad, cout, p2p):
    """Rough per-phase VMEM working set for an HW tile of `th` positions."""
    # Phase 0: x tile (f32, 2 buffers) + one-hot tile + xr out tile (bf16, 2
    # buffers) + f32 intermediates + W_in (2 buffers from default pipeliner).
    p0 = (2 * cin * th * 4 + 2 * th * p2p * 2 + 2 * cpad * th * 2
          + 2 * cpad * th * 4 + 2 * cin * cpad * 2)
    # Phase 1: xr tile (bf16, 2 buffers) + out tile (f32, 2 buffers) + live
    # f32 intermediates (aff/z/zr) + constant weights (2 buffers each).
    p1 = (2 * cpad * th * 2 + 2 * cout * th * 4 + 3 * cpad * th * 4
          + 2 * (2 * cpad * cpad + 2 * p2p * cpad) * 2)
    return max(p0, p1)


def _choose_tile_hw(hw, tile_bytes, budget):
    divisors = [th for th in (4096, 2048, 1024, 512, 256, 128) if hw % th == 0]
    for th in divisors:                       # largest VMEM-fitting divisor
        if tile_bytes(th) <= budget:
            return th
    if divisors:
        return divisors[-1]
    # TODO(synk): HW with no multiple-of-128 divisor falls back to a single
    # full-HW tile; pad/mask HW instead if that exceeds the VMEM budget.
    return hw


# --------------------------------------------------------------------------
# Phase 0: input_redu_conv per HW tile + global-pool & adaptive-pool sums
# --------------------------------------------------------------------------
def _acm_phase0_kernel(x_ref, oh_ref, w_in_ref, b_in_ref,
                       xr_ref, xsum_ref, psum_ref):
    t = pl.program_id(2)

    @pl.when(t == 0)
    def _init():
        xsum_ref[...] = jnp.zeros_like(xsum_ref)
        psum_ref[...] = jnp.zeros_like(psum_ref)

    x = x_ref[0].astype(jnp.bfloat16)                     # (Cin, TH)

    # input_redu_conv: 1x1 conv (BN folded) + bias + ReLU, channels-first.
    xr = jnp.dot(w_in_ref[...], x, preferred_element_type=jnp.float32)
    xr = jnp.maximum(xr + b_in_ref[...], 0.0)             # (Cpad, TH) f32
    xr_ref[0] = xr.astype(xr_ref.dtype)                   # bf16 round trip

    # global_info pooling: running f32 sum of xr over HW.
    xsum_ref[0, 0] = xsum_ref[0, 0] + jnp.sum(xr, axis=1, keepdims=True)

    # adaptive_avg_pool2d(x, P) bin sums: (Cin, TH) @ (TH, P2p) one-hot.
    psum_ref[0, 0] = psum_ref[0, 0] + jnp.dot(
        x, oh_ref[...], preferred_element_type=jnp.float32)


# --------------------------------------------------------------------------
# Phase 1: gla / affinity / z / residual / fusion, channels-first per tile
# --------------------------------------------------------------------------
def _acm_phase1_kernel(xr_ref, bg_ref, pr_ref, w_gla_ref, w_res_ref, w_fus_ref,
                       b_res_ref, b_fus_ref, out_ref):
    xr = xr_ref[0]                                        # (Cpad, TH) bf16

    # gla: global term already folded into bg (= W_gla^T g + b_gla).
    aff = jnp.dot(w_gla_ref[...], xr, preferred_element_type=jnp.float32)
    aff = jax.nn.sigmoid(aff + bg_ref[0])                 # (P2p, TH)

    # z = pooled_redu^T @ affinity -> (Cpad, TH)
    z = jnp.dot(pr_ref[0], aff.astype(jnp.bfloat16),
                preferred_element_type=jnp.float32)

    # residual_conv + ReLU, then ReLU(z_out + xr) (xr re-cast only here).
    zr = jnp.dot(w_res_ref[...], z.astype(jnp.bfloat16),
                 preferred_element_type=jnp.float32)
    zr = jnp.maximum(zr + b_res_ref[...], 0.0)
    zr = jnp.maximum(zr + xr.astype(jnp.float32), 0.0)

    # fusion_conv + ReLU; only the real Cout output rows are computed/stored.
    out = jnp.dot(w_fus_ref[...], zr.astype(jnp.bfloat16),
                  preferred_element_type=jnp.float32)
    out_ref[0] = jnp.maximum(out + b_fus_ref[...], 0.0).astype(out_ref.dtype)


# --------------------------------------------------------------------------
# Parameter prep: fold BN scale into weights, transpose to channels-first,
# pad Cout -> Cpad and P2 -> P2p, cast matmul weights to bf16.
# --------------------------------------------------------------------------
def _prepare_params(p, cin, cout, cpad, p2p):
    f32, bf16 = jnp.float32, jnp.bfloat16

    def fold_t(w, s):
        # (cin_, cout) conv weight with BN scale folded, transposed.
        return (w * s).T.astype(f32)

    wp = {}
    wp["w_inT"] = _pad2d(fold_t(p["w_in"], p["s_in"]), cpad, cin).astype(bf16)
    wp["b_in"] = _pad2d(p["b_in"].T, cpad, 1).astype(f32)
    # pooled_redu_conv / global_info run in tiny f32 XLA glue -> keep f32.
    wp["w_poolT"] = _pad2d(fold_t(p["w_pool"], p["s_pool"]), cpad, cin)
    wp["b_pool"] = _pad2d(p["b_pool"].T, cpad, 1).astype(f32)
    wp["w_globT"] = _pad2d(fold_t(p["w_glob"], p["s_glob"]), cpad, cpad)
    wp["b_glob"] = _pad2d(p["b_glob"].T, cpad, 1).astype(f32)
    # gla (own bias, no BN); the global term g is folded into it in the glue.
    w_glaT = _pad2d(p["w_gla"].T.astype(f32), p2p, cpad)
    wp["w_glaT_f32"] = w_glaT
    wp["w_glaT"] = w_glaT.astype(bf16)
    wp["b_glaT"] = _pad2d(p["bias_gla"].T, p2p, 1).astype(f32)
    wp["w_resT"] = _pad2d(fold_t(p["w_res"], p["s_res"]), cpad, cpad).astype(bf16)
    wp["b_res"] = _pad2d(p["b_res"].T, cpad, 1).astype(f32)
    # fusion_conv: only the real Cout output rows are ever needed.
    wp["w_fusT"] = _pad2d(fold_t(p["w_fus"], p["s_fus"]), cout, cpad).astype(bf16)
    wp["b_fus"] = p["b_fus"].T.astype(f32)
    return wp


# --------------------------------------------------------------------------
# Forward wrapper (takes NCHW like the PyTorch module, returns NCHW)
# --------------------------------------------------------------------------
def adaptive_context_module(x_nchw, params, pool_scale, tile_hw=None):
    B, Cin, H, W = x_nchw.shape
    Cout = params["w_in"].shape[1]
    P = pool_scale
    P2 = P * P
    HW = H * W
    assert H % P == 0 and W % P == 0, "pool_scale must divide spatial dims"
    # TODO(synk): PyTorch adaptive_avg_pool2d with non-divisible H/W uses
    # uneven bins; only the divisible case is implemented here.

    Cpad = _round_up(Cout, 128)
    P2p = _round_up(P2, 8)

    vmem_cap = _vmem_capacity_bytes()
    tile_bytes = lambda th: _tile_vmem_bytes(th, Cin, Cpad, Cout, P2p)
    TH = tile_hw if tile_hw is not None else _choose_tile_hw(
        HW, tile_bytes, (vmem_cap * 3) // 5)
    assert HW % TH == 0 and (TH % 128 == 0 or TH == HW)
    NT = HW // TH
    NS = 2 if NT % 2 == 0 else 1          # phase-0 megacore split (v7x: 2 TCs)
    NTS = NT // NS
    vmem_limit = int(min(vmem_cap - (4 << 20),
                         max(32 << 20, tile_bytes(TH) + (16 << 20))))

    wp = _prepare_params(params, Cin, Cout, Cpad, P2p)

    # Channels-first flat view: no transpose / cast HBM round trips.
    x_cf = x_nchw.reshape(B, Cin, HW)                      # f32, native layout

    # One-hot adaptive-pool bin assignment (HW, P2p); exact 0/1 values.
    hw_idx = jnp.arange(HW, dtype=jnp.int32)
    bins = (hw_idx // W) // (H // P) * P + (hw_idx % W) // (W // P)
    pool_oh = (bins[:, None] ==
               jnp.arange(P2p, dtype=jnp.int32)[None, :]).astype(jnp.bfloat16)

    shared3 = lambda b, s, t: (0, 0)
    shared2 = lambda b, t: (0, 0)

    p0_cost = pl.CostEstimate(
        flops=int(2 * B * HW * Cin * (Cpad + P2p)),
        transcendentals=0,
        bytes_accessed=int(B * HW * (Cin * 4 + Cpad * 2 + P2p * 2)))
    p1_cost = pl.CostEstimate(
        flops=int(2 * B * HW * Cpad * (2 * P2p + Cpad + Cout)),
        transcendentals=int(B * HW * P2p),
        bytes_accessed=int(B * HW * (Cpad * 2 + Cout * 4)))

    # ---------------- phase 0: input_redu_conv + pooling accumulators ------
    xr, xsum, psum = pl.pallas_call(
        _acm_phase0_kernel,
        out_shape=(
            jax.ShapeDtypeStruct((B, Cpad, HW), jnp.bfloat16),   # xr (CF)
            jax.ShapeDtypeStruct((B, NS, Cpad, 1), jnp.float32), # sum(xr)
            jax.ShapeDtypeStruct((B, NS, Cin, P2p), jnp.float32),# pool sums
        ),
        grid_spec=pltpu.PrefetchScalarGridSpec(
            num_scalar_prefetch=0,
            grid=(B, NS, NTS),
            in_specs=[
                pl.BlockSpec((1, Cin, TH), lambda b, s, t: (b, 0, s * NTS + t)),
                pl.BlockSpec((TH, P2p), lambda b, s, t: (s * NTS + t, 0)),
                pl.BlockSpec(wp["w_inT"].shape, shared3),
                pl.BlockSpec(wp["b_in"].shape, shared3),
            ],
            out_specs=[
                pl.BlockSpec((1, Cpad, TH), lambda b, s, t: (b, 0, s * NTS + t)),
                pl.BlockSpec((1, 1, Cpad, 1), lambda b, s, t: (b, s, 0, 0)),
                pl.BlockSpec((1, 1, Cin, P2p), lambda b, s, t: (b, s, 0, 0)),
            ],
        ),
        compiler_params=pltpu.CompilerParams(
            dimension_semantics=("parallel", "parallel", "arbitrary"),
            vmem_limit_bytes=vmem_limit),
        cost_estimate=p0_cost,
    )(x_cf, pool_oh, wp["w_inT"], wp["b_in"])

    # ----- tiny f32 glue: pooled_redu_conv, global_info, fold g into gla ----
    npool = (H // P) * (W // P)
    pooled = jnp.sum(psum, axis=1) / npool                 # (B, Cin, P2p)
    xmean = jnp.sum(xsum, axis=1) / HW                     # (B, Cpad, 1)
    valid_p = (jnp.arange(P2p) < P2).astype(jnp.float32)[None, None, :]
    pr = jnp.maximum(
        jnp.einsum("oc,bcp->bop", wp["w_poolT"], pooled, precision="highest")
        + wp["b_pool"][None], 0.0) * valid_p               # (B, Cpad, P2p)
    g = jnp.maximum(
        jnp.einsum("oc,bci->boi", wp["w_globT"], xmean, precision="highest")
        + wp["b_glob"][None], 0.0)                         # (B, Cpad, 1)
    b_gla_eff = (jnp.einsum("pc,bci->bpi", wp["w_glaT_f32"], g,
                            precision="highest")
                 + wp["b_glaT"][None])                     # (B, P2p, 1)
    pr_bf = pr.astype(jnp.bfloat16)

    # ---------------- phase 1: gla / z / residual / fusion -----------------
    out_cf = pl.pallas_call(
        _acm_phase1_kernel,
        out_shape=jax.ShapeDtypeStruct((B, Cout, HW), jnp.float32),
        grid_spec=pltpu.PrefetchScalarGridSpec(
            num_scalar_prefetch=0,
            grid=(B, NT),
            in_specs=[
                pl.BlockSpec((1, Cpad, TH), lambda b, t: (b, 0, t)),   # xr
                pl.BlockSpec((1, P2p, 1), lambda b, t: (b, 0, 0)),     # b_gla_eff
                pl.BlockSpec((1, Cpad, P2p), lambda b, t: (b, 0, 0)),  # pooled_redu
                pl.BlockSpec(wp["w_glaT"].shape, shared2),
                pl.BlockSpec(wp["w_resT"].shape, shared2),
                pl.BlockSpec(wp["w_fusT"].shape, shared2),
                pl.BlockSpec(wp["b_res"].shape, shared2),
                pl.BlockSpec(wp["b_fus"].shape, shared2),
            ],
            out_specs=pl.BlockSpec((1, Cout, TH), lambda b, t: (b, 0, t)),
        ),
        compiler_params=pltpu.CompilerParams(
            dimension_semantics=("parallel", "parallel"),
            vmem_limit_bytes=vmem_limit),
        cost_estimate=p1_cost,
    )(xr, b_gla_eff, pr_bf, wp["w_glaT"], wp["w_resT"], wp["w_fusT"],
      wp["b_res"], wp["b_fus"])

    return out_cf.reshape(B, Cout, H, W)                   # already NCHW


# --------------------------------------------------------------------------
# Synthetic params & pure-JAX f32 reference
# --------------------------------------------------------------------------
def make_params(key, in_channels, out_channels, pool_scale):
    keys = iter(jax.random.split(key, 32))
    eps = 1e-5

    def conv_w(cin, cout):
        return (jax.random.normal(next(keys), (cin, cout), jnp.float32)
                * (1.0 / jnp.sqrt(cin)))

    def bn_fold(c):
        gamma = 1.0 + 0.1 * jax.random.normal(next(keys), (1, c), jnp.float32)
        beta = 0.1 * jax.random.normal(next(keys), (1, c), jnp.float32)
        mean = 0.1 * jax.random.normal(next(keys), (1, c), jnp.float32)
        var = jnp.abs(jax.random.normal(next(keys), (1, c), jnp.float32)) + 0.5
        scale = gamma / jnp.sqrt(var + eps)
        shift = beta - mean * scale
        return scale, shift

    P2 = pool_scale * pool_scale
    p = {}
    p["w_in"] = conv_w(in_channels, out_channels)
    p["s_in"], p["b_in"] = bn_fold(out_channels)
    p["w_pool"] = conv_w(in_channels, out_channels)
    p["s_pool"], p["b_pool"] = bn_fold(out_channels)
    p["w_glob"] = conv_w(out_channels, out_channels)
    p["s_glob"], p["b_glob"] = bn_fold(out_channels)
    p["w_gla"] = conv_w(out_channels, P2)
    p["bias_gla"] = 0.1 * jax.random.normal(next(keys), (1, P2), jnp.float32)
    p["w_res"] = conv_w(out_channels, out_channels)
    p["s_res"], p["b_res"] = bn_fold(out_channels)
    p["w_fus"] = conv_w(out_channels, out_channels)
    p["s_fus"], p["b_fus"] = bn_fold(out_channels)
    return p


def reference_forward(x_nchw, p, pool_scale):
    B, Cin, H, W = x_nchw.shape
    P = pool_scale
    P2 = P * P
    Cout = p["w_in"].shape[1]
    x_nhwc = jnp.transpose(x_nchw, (0, 2, 3, 1))
    x_flat = x_nhwc.reshape(B, H * W, Cin)
    pooled = x_nhwc.reshape(B, P, H // P, P, W // P, Cin).mean(axis=(2, 4))
    pooled = pooled.reshape(B, P2, Cin)

    relu = lambda v: jnp.maximum(v, 0.0)
    xr = relu(x_flat @ p["w_in"] * p["s_in"] + p["b_in"])
    pr = relu(pooled @ p["w_pool"] * p["s_pool"] + p["b_pool"])
    g = relu(jnp.mean(xr, axis=1, keepdims=True) @ p["w_glob"] * p["s_glob"]
             + p["b_glob"])
    aff = jax.nn.sigmoid((xr + g) @ p["w_gla"] + p["bias_gla"])
    z = aff @ pr
    zr = relu(z @ p["w_res"] * p["s_res"] + p["b_res"])
    zr = relu(zr + xr)
    out = relu(zr @ p["w_fus"] * p["s_fus"] + p["b_fus"])
    return jnp.transpose(out.reshape(B, H, W, Cout), (0, 3, 1, 2))


if __name__ == "__main__":
    B, Cin, H, W = 2, 4, 16, 16
    Cout = 32
    pool_scale = 2

    key = jax.random.PRNGKey(0)
    kx, kp = jax.random.split(key)
    x = jax.random.normal(kx, (B, Cin, H, W), jnp.float32)
    params = make_params(kp, Cin, Cout, pool_scale)

    # tile_hw=128 -> 2 HW tiles per batch, exercising the phase-0 split (NS=2)
    # accumulators and the cross-slot reduction in the glue.
    fwd = jax.jit(functools.partial(adaptive_context_module,
                                    pool_scale=pool_scale, tile_hw=128))
    out = jax.block_until_ready(fwd(x, params))

    ref = reference_forward(x, params, pool_scale)
    assert out.shape == (B, Cout, H, W)
    max_err = float(jnp.max(jnp.abs(out - ref)))
    assert jnp.allclose(out, ref, atol=1e-1, rtol=1e-1), \
        f"mismatch vs reference (max abs err {max_err})"
    print("KERNEL_OK")
</pallas_src>

<mosaic_0001>
module attributes {stable_mosaic.version = 11 : i64} {
  func.func @_acm_phase0_kernel(%arg0: i32, %arg1: i32, %arg2: i32, %arg3: memref<1x4x128xf32, #tpu.memory_space<vmem>>, %arg4: memref<128x8xbf16, #tpu.memory_space<vmem>>, %arg5: memref<128x4xbf16, #tpu.memory_space<vmem>>, %arg6: memref<128x1xf32, #tpu.memory_space<vmem>>, %arg7: memref<1x128x128xbf16, #tpu.memory_space<vmem>>, %arg8: memref<1x1x128x1xf32, #tpu.memory_space<vmem>>, %arg9: memref<1x1x4x8xf32, #tpu.memory_space<vmem>>) attributes {dimension_semantics = [#tpu.dimension_semantics<parallel>, #tpu.dimension_semantics<parallel>, #tpu.dimension_semantics<arbitrary>], iteration_bounds = array<i64: 2, 2, 1>, scalar_prefetch = 0 : i64, scratch_operands = 0 : i64, tpu.core_type = #tpu.core_type<tc>, window_params = [{transform_indices = @transform_0, window_bounds = array<i64: 1, 4, 128>}, {transform_indices = @transform_1, window_bounds = array<i64: 128, 8>}, {pipeline_mode = #tpu.pipeline_mode<synchronous>, transform_indices = @transform_2, window_bounds = array<i64: 128, 4>}, {pipeline_mode = #tpu.pipeline_mode<synchronous>, transform_indices = @transform_3, window_bounds = array<i64: 128, 1>}, {transform_indices = @transform_4, window_bounds = array<i64: 1, 128, 128>}, {transform_indices = @transform_5, window_bounds = array<i64: 1, 1, 128, 1>}, {transform_indices = @transform_6, window_bounds = array<i64: 1, 1, 4, 8>}]} {
    %c0_i32 = arith.constant 0 : i32
    %0 = arith.cmpi eq, %arg2, %c0_i32 : i32
    %1 = arith.extui %0 : i1 to i32
    %c0_i32_0 = arith.constant 0 : i32
    %2 = arith.cmpi ne, %1, %c0_i32_0 : i32
    scf.if %2 {
      %cst_31 = arith.constant 0.000000e+00 : f32
      %33 = vector.broadcast %cst_31 : f32 to vector<1x1x128x1xf32>
      %c0_32 = arith.constant 0 : index
      %c0_33 = arith.constant 0 : index
      %c0_34 = arith.constant 0 : index
      %c0_35 = arith.constant 0 : index
      %34 = vector.load %arg8[%c0_32, %c0_33, %c0_34, %c0_35] : memref<1x1x128x1xf32, #tpu.memory_space<vmem>>, vector<1x1x128x1xf32>
      tpu.vector_store %arg8[%c0_32, %c0_33, %c0_34, %c0_35], %33 {strides = array<i32>} : memref<1x1x128x1xf32, #tpu.memory_space<vmem>>, vector<1x1x128x1xf32>,
      %cst_36 = arith.constant 0.000000e+00 : f32
      %35 = vector.broadcast %cst_36 : f32 to vector<1x1x4x8xf32>
      %c0_37 = arith.constant 0 : index
      %c0_38 = arith.constant 0 : index
      %c0_39 = arith.constant 0 : index
      %c0_40 = arith.constant 0 : index
      %36 = vector.load %arg9[%c0_37, %c0_38, %c0_39, %c0_40] : memref<1x1x4x8xf32, #tpu.memory_space<vmem>>, vector<1x1x4x8xf32>
      tpu.vector_store %arg9[%c0_37, %c0_38, %c0_39, %c0_40], %35 {strides = array<i32>} : memref<1x1x4x8xf32, #tpu.memory_space<vmem>>, vector<1x1x4x8xf32>,
    } else {
    }
    %c0 = arith.constant 0 : index
    %c0_1 = arith.constant 0 : index
    %c0_2 = arith.constant 0 : index
    %3 = vector.load %arg3[%c0, %c0_1, %c0_2] : memref<1x4x128xf32, #tpu.memory_space<vmem>>, vector<1x4x128xf32>
    %4 = vector.shape_cast %3 : vector<1x4x128xf32> to vector<4x128xf32>
    %5 = arith.truncf %4 : vector<4x128xf32> to vector<4x128xbf16>
    %c0_3 = arith.constant 0 : index
    %c0_4 = arith.constant 0 : index
    %6 = vector.load %arg5[%c0_3, %c0_4] : memref<128x4xbf16, #tpu.memory_space<vmem>>, vector<128x4xbf16>
    %cst = arith.constant dense<0.000000e+00> : vector<128x128xf32>
    %7 = tpu.matmul %6, %5, %cst {dimension_numbers = #tpu.dot_dimension_numbers<[1], [0], [0], [1], [0, 0, 1, 1], [], []>} : vector<128x4xbf16>, vector<4x128xbf16>, vector<128x128xf32> -> vector<128x128xf32>
    %c0_5 = arith.constant 0 : index
    %c0_6 = arith.constant 0 : index
    %8 = vector.load %arg6[%c0_5, %c0_6] : memref<128x1xf32, #tpu.memory_space<vmem>>, vector<128x1xf32>
    %9 = vector.broadcast %8 : vector<128x1xf32> to vector<128x128xf32>
    %10 = arith.addf %7, %9 : vector<128x128xf32>
    %cst_7 = arith.constant 0.000000e+00 : f32
    %11 = vector.broadcast %cst_7 : f32 to vector<128x128xf32>
    %12 = arith.maximumf %10, %11 : vector<128x128xf32>
    %13 = arith.truncf %12 : vector<128x128xf32> to vector<128x128xbf16>
    %c0_8 = arith.constant 0 : index
    %c0_9 = arith.constant 0 : index
    %c0_10 = arith.constant 0 : index
    %14 = vector.load %arg7[%c0_8, %c0_9, %c0_10] : memref<1x128x128xbf16, #tpu.memory_space<vmem>>, vector<1x128x128xbf16>
    %15 = vector.shape_cast %14 : vector<1x128x128xbf16> to vector<128x128xbf16>
    %16 = vector.shape_cast %13 : vector<128x128xbf16> to vector<1x128x128xbf16>
    tpu.vector_store %arg7[%c0_8, %c0_9, %c0_10], %16 {strides = array<i32>} : memref<1x128x128xbf16, #tpu.memory_space<vmem>>, vector<1x128x128xbf16>,
    %c0_11 = arith.constant 0 : index
    %c0_12 = arith.constant 0 : index
    %c0_13 = arith.constant 0 : index
    %c0_14 = arith.constant 0 : index
    %17 = vector.load %arg8[%c0_11, %c0_12, %c0_13, %c0_14] : memref<1x1x128x1xf32, #tpu.memory_space<vmem>>, vector<1x1x128x1xf32>
    %18 = vector.shape_cast %17 : vector<1x1x128x1xf32> to vector<128x1xf32>
    %cst_15 = arith.constant dense<0.000000e+00> : vector<128xf32>
    %19 = vector.multi_reduction <add>, %12, %cst_15 [1] : vector<128x128xf32> to vector<128xf32>
    %20 = vector.shape_cast %19 : vector<128xf32> to vector<128x1xf32>
    %21 = arith.addf %18, %20 : vector<128x1xf32>
    %c0_16 = arith.constant 0 : index
    %c0_17 = arith.constant 0 : index
    %c0_18 = arith.constant 0 : index
    %c0_19 = arith.constant 0 : index
    %22 = vector.load %arg8[%c0_16, %c0_17, %c0_18, %c0_19] : memref<1x1x128x1xf32, #tpu.memory_space<vmem>>, vector<1x1x128x1xf32>
    %23 = vector.shape_cast %22 : vector<1x1x128x1xf32> to vector<128x1xf32>
    %24 = vector.shape_cast %21 : vector<128x1xf32> to vector<1x1x128x1xf32>
    tpu.vector_store %arg8[%c0_16, %c0_17, %c0_18, %c0_19], %24 {strides = array<i32>} : memref<1x1x128x1xf32, #tpu.memory_space<vmem>>, vector<1x1x128x1xf32>,
    %c0_20 = arith.constant 0 : index
    %c0_21 = arith.constant 0 : index
    %c0_22 = arith.constant 0 : index
    %c0_23 = arith.constant 0 : index
    %25 = vector.load %arg9[%c0_20, %c0_21, %c0_22, %c0_23] : memref<1x1x4x8xf32, #tpu.memory_space<vmem>>, vector<1x1x4x8xf32>
    %26 = vector.shape_cast %25 : vector<1x1x4x8xf32> to vector<4x8xf32>
    %c0_24 = arith.constant 0 : index
    %c0_25 = arith.constant 0 : index
    %27 = vector.load %arg4[%c0_24, %c0_25] : memref<128x8xbf16, #tpu.memory_space<vmem>>, vector<128x8xbf16>
    %cst_26 = arith.constant dense<0.000000e+00> : vector<4x8xf32>
    %28 = tpu.matmul %5, %27, %cst_26 {dimension_numbers = #tpu.dot_dimension_numbers<[1], [0], [0], [1], [0, 0, 1, 1], [], []>} : vector<4x128xbf16>, vector<128x8xbf16>, vector<4x8xf32> -> vector<4x8xf32>
    %29 = arith.addf %26, %28 : vector<4x8xf32>
    %c0_27 = arith.constant 0 : index
    %c0_28 = arith.constant 0 : index
    %c0_29 = arith.constant 0 : index
    %c0_30 = arith.constant 0 : index
    %30 = vector.load %arg9[%c0_27, %c0_28, %c0_29, %c0_30] : memref<1x1x4x8xf32, #tpu.memory_space<vmem>>, vector<1x1x4x8xf32>
    %31 = vector.shape_cast %30 : vector<1x1x4x8xf32> to vector<4x8xf32>
    %32 = vector.shape_cast %29 : vector<4x8xf32> to vector<1x1x4x8xf32>
    tpu.vector_store %arg9[%c0_27, %c0_28, %c0_29, %c0_30], %32 {strides = array<i32>} : memref<1x1x4x8xf32, #tpu.memory_space<vmem>>, vector<1x1x4x8xf32>,
    return
  }
  func.func @transform_0(%arg0: i32, %arg1: i32, %arg2: i32) -> (i32, i32, i32) {
    %c1_i32 = arith.constant 1 : i32
    %0 = arith.muli %arg1, %c1_i32 : i32
    %1 = arith.addi %0, %arg2 : i32
    %c0_i32 = arith.constant 0 : i32
    %c0_i32_0 = arith.constant 0 : i32
    return %arg0, %c0_i32, %1 : i32, i32, i32
  }
  func.func @transform_1(%arg0: i32, %arg1: i32, %arg2: i32) -> (i32, i32) {
    %c1_i32 = arith.constant 1 : i32
    %0 = arith.muli %arg1, %c1_i32 : i32
    %1 = arith.addi %0, %arg2 : i32
    %c0_i32 = arith.constant 0 : i32
    %c0_i32_0 = arith.constant 0 : i32
    return %1, %c0_i32 : i32, i32
  }
  func.func @transform_2(%arg0: i32, %arg1: i32, %arg2: i32) -> (i32, i32) {
    %c0_i32 = arith.constant 0 : i32
    %c0_i32_0 = arith.constant 0 : i32
    %c0_i32_1 = arith.constant 0 : i32
    return %c0_i32, %c0_i32_0 : i32, i32
  }
  func.func @transform_3(%arg0: i32, %arg1: i32, %arg2: i32) -> (i32, i32) {
    %c0_i32 = arith.constant 0 : i32
    %c0_i32_0 = arith.constant 0 : i32
    %c0_i32_1 = arith.constant 0 : i32
    return %c0_i32, %c0_i32_0 : i32, i32
  }
  func.func @transform_4(%arg0: i32, %arg1: i32, %arg2: i32) -> (i32, i32, i32) {
    %c1_i32 = arith.constant 1 : i32
    %0 = arith.muli %arg1, %c1_i32 : i32
    %1 = arith.addi %0, %arg2 : i32
    %c0_i32 = arith.constant 0 : i32
    %c0_i32_0 = arith.constant 0 : i32
    return %arg0, %c0_i32, %1 : i32, i32, i32
  }
  func.func @transform_5(%arg0: i32, %arg1: i32, %arg2: i32) -> (i32, i32, i32, i32) {
    %c0_i32 = arith.constant 0 : i32
    %c0_i32_0 = arith.constant 0 : i32
    %c0_i32_1 = arith.constant 0 : i32
    return %arg0, %arg1, %c0_i32, %c0_i32_0 : i32, i32, i32, i32
  }
  func.func @transform_6(%arg0: i32, %arg1: i32, %arg2: i32) -> (i32, i32, i32, i32) {
    %c0_i32 = arith.constant 0 : i32
    %c0_i32_0 = arith.constant 0 : i32
    %c0_i32_1 = arith.constant 0 : i32
    return %arg0, %arg1, %c0_i32, %c0_i32_0 : i32, i32, i32, i32
  }
}

module attributes {stable_mosaic.version = 11 : i64} {
  func.func @_acm_phase1_kernel(%arg0: i32, %arg1: i32, %arg2: memref<1x128x128xbf16, #tpu.memory_space<vmem>>, %arg3: memref<1x8x1xf32, #tpu.memory_space<vmem>>, %arg4: memref<1x128x8xbf16, #tpu.memory_space<vmem>>, %arg5: memref<8x128xbf16, #tpu.memory_space<vmem>>, %arg6: memref<128x128xbf16, #tpu.memory_space<vmem>>, %arg7: memref<32x128xbf16, #tpu.memory_space<vmem>>, %arg8: memref<128x1xf32, #tpu.memory_space<vmem>>, %arg9: memref<32x1xf32, #tpu.memory_space<vmem>>, %arg10: memref<1x32x128xf32, #tpu.memory_space<vmem>>) attributes {dimension_semantics = [#tpu.dimension_semantics<parallel>, #tpu.dimension_semantics<parallel>], iteration_bounds = array<i64: 2, 2>, scalar_prefetch = 0 : i64, scratch_operands = 0 : i64, tpu.core_type = #tpu.core_type<tc>, window_params = [{transform_indices = @transform_0, window_bounds = array<i64: 1, 128, 128>}, {transform_indices = @transform_1, window_bounds = array<i64: 1, 8, 1>}, {transform_indices = @transform_2, window_bounds = array<i64: 1, 128, 8>}, {pipeline_mode = #tpu.pipeline_mode<synchronous>, transform_indices = @transform_3, window_bounds = array<i64: 8, 128>}, {pipeline_mode = #tpu.pipeline_mode<synchronous>, transform_indices = @transform_4, window_bounds = array<i64: 128, 128>}, {pipeline_mode = #tpu.pipeline_mode<synchronous>, transform_indices = @transform_5, window_bounds = array<i64: 32, 128>}, {pipeline_mode = #tpu.pipeline_mode<synchronous>, transform_indices = @transform_6, window_bounds = array<i64: 128, 1>}, {pipeline_mode = #tpu.pipeline_mode<synchronous>, transform_indices = @transform_7, window_bounds = array<i64: 32, 1>}, {transform_indices = @transform_8, window_bounds = array<i64: 1, 32, 128>}]} {
    %c0 = arith.constant 0 : index
    %c0_0 = arith.constant 0 : index
    %c0_1 = arith.constant 0 : index
    %0 = vector.load %arg2[%c0, %c0_0, %c0_1] : memref<1x128x128xbf16, #tpu.memory_space<vmem>>, vector<1x128x128xbf16>
    %1 = vector.shape_cast %0 : vector<1x128x128xbf16> to vector<128x128xbf16>
    %c0_2 = arith.constant 0 : index
    %c0_3 = arith.constant 0 : index
    %2 = vector.load %arg5[%c0_2, %c0_3] : memref<8x128xbf16, #tpu.memory_space<vmem>>, vector<8x128xbf16>
    %cst = arith.constant dense<0.000000e+00> : vector<8x128xf32>
    %3 = tpu.matmul %2, %1, %cst {dimension_numbers = #tpu.dot_dimension_numbers<[1], [0], [0], [1], [0, 0, 1, 1], [], []>} : vector<8x128xbf16>, vector<128x128xbf16>, vector<8x128xf32> -> vector<8x128xf32>
    %c0_4 = arith.constant 0 : index
    %c0_5 = arith.constant 0 : index
    %c0_6 = arith.constant 0 : index
    %4 = vector.load %arg3[%c0_4, %c0_5, %c0_6] : memref<1x8x1xf32, #tpu.memory_space<vmem>>, vector<1x8x1xf32>
    %5 = vector.shape_cast %4 : vector<1x8x1xf32> to vector<8x1xf32>
    %6 = vector.broadcast %5 : vector<8x1xf32> to vector<8x128xf32>
    %7 = arith.addf %3, %6 : vector<8x128xf32>
    %8 = arith.negf %7 : vector<8x128xf32>
    %9 = math.exp %8 : vector<8x128xf32>
    %cst_7 = arith.constant 1.000000e+00 : f32
    %10 = vector.broadcast %cst_7 : f32 to vector<8x128xf32>
    %11 = arith.addf %10, %9 : vector<8x128xf32>
    %12 = arith.divf %10, %11 : vector<8x128xf32>
    %c0_8 = arith.constant 0 : index
    %c0_9 = arith.constant 0 : index
    %c0_10 = arith.constant 0 : index
    %13 = vector.load %arg4[%c0_8, %c0_9, %c0_10] : memref<1x128x8xbf16, #tpu.memory_space<vmem>>, vector<1x128x8xbf16>
    %14 = vector.shape_cast %13 : vector<1x128x8xbf16> to vector<128x8xbf16>
    %15 = arith.truncf %12 : vector<8x128xf32> to vector<8x128xbf16>
    %cst_11 = arith.constant dense<0.000000e+00> : vector<128x128xf32>
    %16 = tpu.matmul %14, %15, %cst_11 {dimension_numbers = #tpu.dot_dimension_numbers<[1], [0], [0], [1], [0, 0, 1, 1], [], []>} : vector<128x8xbf16>, vector<8x128xbf16>, vector<128x128xf32> -> vector<128x128xf32>
    %c0_12 = arith.constant 0 : index
    %c0_13 = arith.constant 0 : index
    %17 = vector.load %arg6[%c0_12, %c0_13] : memref<128x128xbf16, #tpu.memory_space<vmem>>, vector<128x128xbf16>
    %18 = arith.truncf %16 : vector<128x128xf32> to vector<128x128xbf16>
    %cst_14 = arith.constant dense<0.000000e+00> : vector<128x128xf32>
    %19 = tpu.matmul %17, %18, %cst_14 {dimension_numbers = #tpu.dot_dimension_numbers<[1], [0], [0], [1], [0, 0, 1, 1], [], []>} : vector<128x128xbf16>, vector<128x128xbf16>, vector<128x128xf32> -> vector<128x128xf32>
    %c0_15 = arith.constant 0 : index
    %c0_16 = arith.constant 0 : index
    %20 = vector.load %arg8[%c0_15, %c0_16] : memref<128x1xf32, #tpu.memory_space<vmem>>, vector<128x1xf32>
    %21 = vector.broadcast %20 : vector<128x1xf32> to vector<128x128xf32>
    %22 = arith.addf %19, %21 : vector<128x128xf32>
    %cst_17 = arith.constant 0.000000e+00 : f32
    %23 = vector.broadcast %cst_17 : f32 to vector<128x128xf32>
    %24 = arith.maximumf %22, %23 : vector<128x128xf32>
    %25 = arith.extf %1 : vector<128x128xbf16> to vector<128x128xf32>
    %26 = arith.addf %24, %25 : vector<128x128xf32>
    %cst_18 = arith.constant 0.000000e+00 : f32
    %27 = vector.broadcast %cst_18 : f32 to vector<128x128xf32>
    %28 = arith.maximumf %26, %27 : vector<128x128xf32>
    %c0_19 = arith.constant 0 : index
    %c0_20 = arith.constant 0 : index
    %29 = vector.load %arg7[%c0_19, %c0_20] : memref<32x128xbf16, #tpu.memory_space<vmem>>, vector<32x128xbf16>
    %30 = arith.truncf %28 : vector<128x128xf32> to vector<128x128xbf16>
    %cst_21 = arith.constant dense<0.000000e+00> : vector<32x128xf32>
    %31 = tpu.matmul %29, %30, %cst_21 {dimension_numbers = #tpu.dot_dimension_numbers<[1], [0], [0], [1], [0, 0, 1, 1], [], []>} : vector<32x128xbf16>, vector<128x128xbf16>, vector<32x128xf32> -> vector<32x128xf32>
    %c0_22 = arith.constant 0 : index
    %c0_23 = arith.constant 0 : index
    %32 = vector.load %arg9[%c0_22, %c0_23] : memref<32x1xf32, #tpu.memory_space<vmem>>, vector<32x1xf32>
    %33 = vector.broadcast %32 : vector<32x1xf32> to vector<32x128xf32>
    %34 = arith.addf %31, %33 : vector<32x128xf32>
    %cst_24 = arith.constant 0.000000e+00 : f32
    %35 = vector.broadcast %cst_24 : f32 to vector<32x128xf32>
    %36 = arith.maximumf %34, %35 : vector<32x128xf32>
    %c0_25 = arith.constant 0 : index
    %c0_26 = arith.constant 0 : index
    %c0_27 = arith.constant 0 : index
    %37 = vector.load %arg10[%c0_25, %c0_26, %c0_27] : memref<1x32x128xf32, #tpu.memory_space<vmem>>, vector<1x32x128xf32>
    %38 = vector.shape_cast %37 : vector<1x32x128xf32> to vector<32x128xf32>
    %39 = vector.shape_cast %36 : vector<32x128xf32> to vector<1x32x128xf32>
    tpu.vector_store %arg10[%c0_25, %c0_26, %c0_27], %39 {strides = array<i32>} : memref<1x32x128xf32, #tpu.memory_space<vmem>>, vector<1x32x128xf32>,
    return
  }
  func.func @transform_0(%arg0: i32, %arg1: i32) -> (i32, i32, i32) {
    %c0_i32 = arith.constant 0 : i32
    %c0_i32_0 = arith.constant 0 : i32
    return %arg0, %c0_i32, %arg1 : i32, i32, i32
  }
  func.func @transform_1(%arg0: i32, %arg1: i32) -> (i32, i32, i32) {
    %c0_i32 = arith.constant 0 : i32
    %c0_i32_0 = arith.constant 0 : i32
    %c0_i32_1 = arith.constant 0 : i32
    return %arg0, %c0_i32, %c0_i32_0 : i32, i32, i32
  }
  func.func @transform_2(%arg0: i32, %arg1: i32) -> (i32, i32, i32) {
    %c0_i32 = arith.constant 0 : i32
    %c0_i32_0 = arith.constant 0 : i32
    %c0_i32_1 = arith.constant 0 : i32
    return %arg0, %c0_i32, %c0_i32_0 : i32, i32, i32
  }
  func.func @transform_3(%arg0: i32, %arg1: i32) -> (i32, i32) {
    %c0_i32 = arith.constant 0 : i32
    %c0_i32_0 = arith.constant 0 : i32
    %c0_i32_1 = arith.constant 0 : i32
    return %c0_i32, %c0_i32_0 : i32, i32
  }
  func.func @transform_4(%arg0: i32, %arg1: i32) -> (i32, i32) {
    %c0_i32 = arith.constant 0 : i32
    %c0_i32_0 = arith.constant 0 : i32
    %c0_i32_1 = arith.constant 0 : i32
    return %c0_i32, %c0_i32_0 : i32, i32
  }
  func.func @transform_5(%arg0: i32, %arg1: i32) -> (i32, i32) {
    %c0_i32 = arith.constant 0 : i32
    %c0_i32_0 = arith.constant 0 : i32
    %c0_i32_1 = arith.constant 0 : i32
    return %c0_i32, %c0_i32_0 : i32, i32
  }
  func.func @transform_6(%arg0: i32, %arg1: i32) -> (i32, i32) {
    %c0_i32 = arith.constant 0 : i32
    %c0_i32_0 = arith.constant 0 : i32
    %c0_i32_1 = arith.constant 0 : i32
    return %c0_i32, %c0_i32_0 : i32, i32
  }
  func.func @transform_7(%arg0: i32, %arg1: i32) -> (i32, i32) {
    %c0_i32 = arith.constant 0 : i32
    %c0_i32_0 = arith.constant 0 : i32
    %c0_i32_1 = arith.constant 0 : i32
    return %c0_i32, %c0_i32_0 : i32, i32
  }
  func.func @transform_8(%arg0: i32, %arg1: i32) -> (i32, i32, i32) {
    %c0_i32 = arith.constant 0 : i32
    %c0_i32_0 = arith.constant 0 : i32
    return %arg0, %c0_i32, %arg1 : i32, i32, i32
  }
}

</mosaic_0001>

<bundles_post_ra>
// kernel: adaptive_context_module.2
= control target key start
LH: loop header
LB: loop body
LE: loop exit
PB: predicated region body
PF: predicated region fallthrough
CT: control target
= control target key end

     0   :  { %s1597_s21 = smov 0   ;;  %s1599_s22 = smov 0   ;;  %s1941_s0 = inlined_call_operand.vmem [shape: f32[2,4,256], index: 0, kind: input, shape index: {}]   ;;  %s1942_s1 = inlined_call_operand.vmem [shape: bf16[256,8], index: 1, kind: input, shape index: {}]   ;;  %s1943_s2 = inlined_call_operand.vmem [shape: bf16[128,4], index: 2, kind: input, shape index: {}]   ;;  %s1944_s3 = inlined_call_operand.vmem [shape: f32[128,1], index: 3, kind: input, shape index: {}]   ;;  %s1945_s4 = inlined_call_operand.vmem [shape: bf16[2,128,256], index: 4, kind: output, shape index: {0}]   ;;  %s1946_s5 = inlined_call_operand.vmem [shape: f32[2,2,128,1], index: 5, kind: output, shape index: {1}]   ;;  %s1947_s6 = inlined_call_operand.vmem [shape: f32[2,2,4,8], index: 6, kind: output, shape index: {2}]  }
   0x1   :  { %s1601_s23 = smov 0   ;;  %s1603_s24 = smov 0  }
   0x2   :  { %s1605_s25 = smov 0   ;;  %s1607_s26 = smov 0  }
   0x3   :  { %s1609_s27 = smov 0  }
   0x4 LB: > { %s32_s28 = sadd.s32 1, %s1549_s25  ;;  %s36_s29 = sadd.s32 1, %s1553_s26  ;;  %s1557_s27 = sphi %s1609_s27, %s17_s27   ;;  %s1553_s26 = sphi %s1607_s26, %s1954_s26   ;;  %s1549_s25 = sphi %s1605_s25, %s1953_s25   ;;  %s1545_s24 = sphi %s1603_s24, %s1952_s24   ;;  %s1541_s23 = sphi %s1601_s23, %s1951_s23   ;;  %s1537_s22 = sphi %s1599_s22, %s1950_s22   ;;  %s1533_s21 = sphi %s1597_s21, %s1949_s21  }
   0x5   : > { %p34_p0 = scmp.ge.s32.totalorder %s32_s28, 2  ;;  %s1246_s30 = sadd.s32 4294967295, %s1557_s27  }
   0x6   : > { %p157_p1 = scmp.ne.s32.totalorder %s1537_s22, %s1533_s21  ;;  %p158_p2 = scmp.eq.s32.totalorder %s1246_s30, 3 }
   0x7   : > { %s1956_s28 = smov (%p34_p0, %s32_s28), 0  ;;  %s1958_s29 = smov (!%p34_p0, %s36_s29), %s1553_s26 }
   0x8   : > { %s143_s7 = ssub.s32 %s1549_s25, %s1956_s28  ;;  %p38_p3 = scmp.ge.s32.totalorder %s1958_s29, 2 }
   0x9   : > { %p1250_p4 = scmp.ge.s32.totalorder %s1557_s27, 1  ;;  %p1643_p5 = por %p158_p2, %p157_p1 }
   0xa   : > { %p268_p6 = scmp.lt.s32.totalorder %s1557_s27, 5  ;;  %s1960_s29 = smov (%p38_p3, %s1958_s29), 0 }
   0xb   : > { %s142_s9 = ssub.s32 %s1553_s26, %s1960_s29  ;;  %s147_s11 = sadd.s32 1, %s1537_s22 }
   0xc   : > { %p269_p7 = pnand %p1250_p4, %p268_p6  ;;  %s144_s10 = sor.u32 %s143_s7, %s142_s9 }
   0xd   : > { %p145_p8 = scmp.eq.s32.totalorder %s144_s10, 0  ;;  %p325_p9 = scmp.lt.s32.totalorder (!%p269_p7), %s1545_s24, 1  ;;  %v1487_v0 = vld [vmem:[%s1943_s2] sm:$0xff] (!%p269_p7)   ;;  %vm538_vm0 = vcmask (!%p269_p7), 31744   ;;  %vm563_vm1 = vcmask (!%p269_p7), 1041408   ;;  %v1559_v3 = vmov (!%p269_p7), 0  }
   0xe   : > { %272 = sbr.rel (%p269_p7) target bundleno = 427 (0x1ab), region = 36  ;;  %p327_p10 = scmp.lt.s32.totalorder (!%p269_p7), %s1541_s23, 1  ;;  %1389 = vmatprep.mubr.msk.bf16.mxu0 (!%p269_p7), %vm538_vm0, %v1487_v0  ;;  %1486 = vset.pattern.permute.xlu1 (!%p269_p7), %v1559_v3  ;;  %v404_v4 = vld [vmem:[%s1944_s3 + $0x10] sm:$0xff] (!%p269_p7)  ;;  %v402_v5 = vld [vmem:[%s1944_s3] sm:$0xff] (!%p269_p7)  ;;  %v1488_v7 = vld [vmem:[%s1943_s2 + $0x8] sm:$0xff] (!%p269_p7)   ;;  %v1560_v10 = vmov (!%p269_p7), 0.0  }
   0xf   : > { %s1654_s12 = scalar_select %p145_p8, %s1537_s22, %s147_s11  }
  0x10   : > { %1485 = vset.pattern.permute.xlu0 (!%p269_p7), %v1559_v3  ;;  %430 = vperm.xlu1 (!%p269_p7), %1486, %v404_v4   ;;  %v405_v8 = vld [vmem:[%s1944_s3 + $0x18] sm:$0xff] (!%p269_p7)  ;;  %v403_v9 = vld [vmem:[%s1944_s3 + $0x8] sm:$0xff] (!%p269_p7)  ;;  %v1489_v11 = vld [vmem:[%s1943_s2 + $0x10] sm:$0xff] (!%p269_p7)   ;;  %vm1561_vm2 = vmmov (!%p269_p7), 0   ;;  %vm365_vm3 = vcmask (!%p269_p7), 7168   ;;  %vm382_vm4 = vcmask (!%p269_p7), 60416  }
  0x11   : > { %420 = vperm.xlu0 (!%p269_p7), %1485, %v402_v5   ;;  %1405 = vmatprep.subr.bf16.mxu1 (!%p269_p7), %v1560_v10  ;;  %v407_v12 = vld [vmem:[%s1944_s3 + $0x28] sm:$0xff] (!%p269_p7)  ;;  %v406_v13 = vld [vmem:[%s1944_s3 + $0x20] sm:$0xff] (!%p269_p7)  ;;  %v1490_v15 = vld [vmem:[%s1943_s2 + $0x18] sm:$0xff] (!%p269_p7)  }
  0x12   : > { %1421 = vmatprep.mubr.msk.bf16.mxu1 (!%p269_p7), %vm1561_vm2, %v1560_v10  ;;  %v409_v16 = vld [vmem:[%s1944_s3 + $0x38] sm:$0xff] (!%p269_p7)  ;;  %v408_v17 = vld [vmem:[%s1944_s3 + $0x30] sm:$0xff] (!%p269_p7)  ;;  %v1491_v19 = vld [vmem:[%s1943_s2 + $0x20] sm:$0xff] (!%p269_p7)  }
  0x13   : > { %v411_v20 = vld [vmem:[%s1944_s3 + $0x48] sm:$0xff] (!%p269_p7)  ;;  %v410_v21 = vld [vmem:[%s1944_s3 + $0x40] sm:$0xff] (!%p269_p7)  ;;  %v413_v24 = vld [vmem:[%s1944_s3 + $0x58] sm:$0xff] (!%p269_p7) }
  0x14   : > { %435 = vperm.xlu1 (!%p269_p7), %1486, %v405_v8   ;;  %v1492_v23 = vld [vmem:[%s1943_s2 + $0x28] sm:$0xff] (!%p269_p7)   ;;  %v412_v25 = vld [vmem:[%s1944_s3 + $0x50] sm:$0xff] (!%p269_p7)  ;;  %v414_v29 = vld [vmem:[%s1944_s3 + $0x60] sm:$0xff] (!%p269_p7) }
  0x15   : > { %s326_s15 = scalar_select %p325_p9, %s1545_s24, 1  ;;  %425 = vperm.xlu0 %1485, %v403_v9   ;;  %v1493_v27 = vld [vmem:[%s1943_s2 + $0x30] sm:$0xff]   ;;  %v415_v28 = vld [vmem:[%s1944_s3 + $0x68] sm:$0xff]  ;;  %v1494_v31 = vld [vmem:[%s1943_s2 + $0x38] sm:$0xff]  }
  0x16   : > { %s328_s16 = scalar_select %p327_p10, %s1541_s23, 1  ;;  %v417_v32 = vld [vmem:[%s1944_s3 + $0x78] sm:$0xff]  ;;  %v416_v33 = vld [vmem:[%s1944_s3 + $0x70] sm:$0xff] }
  0x17   : > { %s1252_s17 = sshll.u32 %s326_s15, 1  ;;  %s1257_s18 = sshll.u32 %s326_s15, 5 }
  0x18   : > { %s1664_s19 = sadd.s32 %s1252_s17, %s328_s16  ;;  %s1256_s20 = sshll.u32 %s328_s16, 4  ;;  %445 = vperm.xlu1 %1486, %v407_v12  }
  0x19   : > { %s1253_s30 = sshll.u32 %s1664_s19, 2  ;;  %s1667_s7 = sadd.s32 %s1257_s18, %s1256_s20  ;;  %440 = vperm.xlu0 %1485, %v406_v13  }
  0x1a   : > { %s332_s11 = scalar_lea.vmem %s1941_s0, %s1253_s30  ;;  %s1254_s17 = sshll.u32 %s1541_s23, 4 }
  0x1b   : > { %v384_v1 = vld [vmem:[%s332_s11] sm:$0xf]  ;;  %p336_p11 = scmp.lt.s32.totalorder %s1254_s17, 31  ;;  %s1258_s20 = sshll.u32 %s1667_s7, 3 }
  0x1c   : > { %v1674_v2 = vpack.c.bf16 %v384_v1, %v384_v1  ;;  %455 = vperm.xlu1 %1486, %v409_v16   ;;  %s300_s7 = sand.u32 1, %s1533_s21   ;;  %s1302_s19 = sshll.u32 (%p1643_p5), %s1545_s24, 5 }
  0x1d   : > { %s1962_s17 = smov (!%p336_p11, %s1254_s17), 31  ;;  %450 = vperm.xlu0 %1485, %v408_v17  }
  0x1e   : > { %1425 = vmatprep.subr.msk.bf16.mxu0 %vm563_vm1, %v1674_v2  ;;  %v565_v6 = vsel %vm563_vm1, %v1674_v2, 0  ;;  %s1255_s16 = sshll.u32 %s1962_s17, 2  ;;  %s359_s17 = scalar_lea.vmem %s1947_s6, %s1253_s30 }
  0x1f   : > { %1388 = vmatpush3.bf16.msra.mxu0 %v565_v6  ;;  %s1709_s14 = scalar_lea.vmem %s1942_s1, %s1255_s16  ;;  %s1782_s16 = scalar_lea.vmem %s1946_s5, %s1258_s20  ;;  %383 = vst.msk [vmem:[%s359_s17] sm:$0xf] %vm382_vm4, %v1560_v10 }
  0x20   : > { %v1495_v14 = vld [vmem:[%s1709_s14] sm:$0xff]   ;;  %v1496_v18 = vld [vmem:[%s1709_s14 + $0x8] sm:$0xff]   ;;  %v1497_v22 = vld [vmem:[%s1709_s14 + $0x10] sm:$0xff]   ;;  %465 = vperm.xlu1 %1486, %v411_v20   ;;  %368 = vst.msk [vmem:[%s1782_s16 + $0x10] sm:$0xff] %vm365_vm3, %v1560_v10  ;;  %s975_s30 = sadd.s32 (%p1643_p5), %s1541_s23, %s1302_s19 }
  0x21   : > { %1406 = vmatpush3.bf16.msra.mxu1 %v1495_v14  ;;  %460 = vperm.xlu0 %1485, %v410_v21   ;;  %v1498_v26 = vld [vmem:[%s1709_s14 + $0x18] sm:$0xff]   ;;  %v1499_v30 = vld [vmem:[%s1709_s14 + $0x20] sm:$0xff]   ;;  %v1500_v34 = vld [vmem:[%s1709_s14 + $0x28] sm:$0xff]   ;;  %366 = vst.msk [vmem:[%s1782_s16] sm:$0xff] %vm365_vm3, %v1560_v10  ;;  %s1303_s8 = sshll.u32 (%p1643_p5), %s975_s30, 2 }
  0x22   : > { %1390 = vmatmul.mubr.msk.bf16.vlgmr.msra.gmra.mrb[0].mxu0 %vm538_vm0, %v1488_v7  ;;  %1407 = vmatprep.subr.bf16.mxu1 %v1560_v10  ;;  %v1501_v35 = vld [vmem:[%s1709_s14 + $0x30] sm:$0xff]   ;;  %v1502_v36 = vld [vmem:[%s1709_s14 + $0x38] sm:$0xff]   ;;  %367 = vst.msk [vmem:[%s1782_s16 + $0x8] sm:$0xff] %vm365_vm3, %v1560_v10  ;;  %369 = vst.msk [vmem:[%s1782_s16 + $0x18] sm:$0xff] %vm365_vm3, %v1560_v10  ;;  %s1251_s14 = sshll.u32 %s300_s7, 6  ;;  %s977_s20 = scalar_lea.vmem (%p1643_p5), %s1945_s4, %s1303_s8 }
  0x23   : > { %1393 = vmatprep.mubr.msk.bf16.mxu0 %vm538_vm0, %v1489_v11  ;;  %370 = vst.msk [vmem:[%s1782_s16 + $0x20] sm:$0xff] %vm365_vm3, %v1560_v10  ;;  %371 = vst.msk [vmem:[%s1782_s16 + $0x28] sm:$0xff] %vm365_vm3, %v1560_v10  ;;  %s1833_s21 = scalar_lea.vmem [#allocation2], %s1251_s14 }
  0x24   : > { %475 = vperm.xlu1 %1486, %v413_v24   ;;  %372 = vst.msk [vmem:[%s1782_s16 + $0x30] sm:$0xff] %vm365_vm3, %v1560_v10  ;;  %373 = vst.msk [vmem:[%s1782_s16 + $0x38] sm:$0xff] %vm365_vm3, %v1560_v10 }
  0x25   : > { %1408 = vmatpush3.bf16.msra.mxu1 %v1496_v18  ;;  %470 = vperm.xlu0 %1485, %v412_v25   ;;  %374 = vst.msk [vmem:[%s1782_s16 + $0x40] sm:$0xff] %vm365_vm3, %v1560_v10  ;;  %375 = vst.msk [vmem:[%s1782_s16 + $0x48] sm:$0xff] %vm365_vm3, %v1560_v10 }
  0x26   : > { %1409 = vmatprep.subr.bf16.mxu1 %v1560_v10  ;;  %376 = vst.msk [vmem:[%s1782_s16 + $0x50] sm:$0xff] %vm365_vm3, %v1560_v10  ;;  %377 = vst.msk [vmem:[%s1782_s16 + $0x58] sm:$0xff] %vm365_vm3, %v1560_v10 }
  0x27   : > { %378 = vst.msk [vmem:[%s1782_s16 + $0x60] sm:$0xff] %vm365_vm3, %v1560_v10  ;;  %379 = vst.msk [vmem:[%s1782_s16 + $0x68] sm:$0xff] %vm365_vm3, %v1560_v10 }
  0x28   : > { %485 = vperm.xlu1 %1486, %v415_v28   ;;  %380 = vst.msk [vmem:[%s1782_s16 + $0x70] sm:$0xff] %vm365_vm3, %v1560_v10  ;;  %381 = vst.msk [vmem:[%s1782_s16 + $0x78] sm:$0xff] %vm365_vm3, %v1560_v10 }
  0x29   : > { %1410 = vmatpush3.bf16.msra.mxu1 %v1497_v22  ;;  %480 = vperm.xlu0 %1485, %v414_v29  }
  0x2a   : > { %1394 = vmatmul.mubr.msk.bf16.gmra.mrb[4].mxu0 %vm538_vm0, %v1490_v15  ;;  %1411 = vmatprep.subr.bf16.mxu1 %v1560_v10 }
  0x2b   : > { %1397 = vmatprep.mubr.msk.bf16.mxu0 %vm538_vm0, %v1491_v19 }
  0x2c   : > { %495 = vperm.xlu1 %1486, %v417_v32  }
  0x2d   : > { %1412 = vmatpush3.bf16.msra.mxu1 %v1498_v26  ;;  %490 = vperm.xlu0 %1485, %v416_v33  }
  0x2e   : > { %1413 = vmatprep.subr.bf16.mxu1 %v1560_v10 }
  0x31   : > { %1414 = vmatpush3.bf16.msra.mxu1 %v1499_v30 }
  0x32   : > { %1398 = vmatmul.mubr.msk.bf16.gmra.mrb[8].mxu0 %vm538_vm0, %v1492_v23  ;;  %1415 = vmatprep.subr.bf16.mxu1 %v1560_v10 }
  0x33   : > { %1401 = vmatprep.mubr.msk.bf16.mxu0 %vm538_vm0, %v1493_v27 }
  0x35   : > { %1416 = vmatpush3.bf16.msra.mxu1 %v1500_v34 }
  0x36   : > { %1417 = vmatprep.subr.bf16.mxu1 %v1560_v10 }
  0x39   : > { %1418 = vmatpush3.bf16.msra.mxu1 %v1501_v35 }
  0x3a   : > { %1402 = vmatmul.mubr.msk.bf16.gmra.mrb[12].mxu0 %vm538_vm0, %v1494_v31  ;;  %1419 = vmatprep.subr.bf16.mxu1 %v1560_v10 }
  0x3d   : > { %1420 = vmatpush3.bf16.msra.mxu1 %v1502_v36 }
  0x40   : > { %1422 = vmatmul.mubr.bf16.vlgmr.msra.gmra.mrb[0].mxu1 %v1674_v2 }
  0x8f   : > { %v431_v38 = vpop.permute.xlu1 %430 }
  0x90   : > { %v421_v37 = vpop.permute.xlu0 %420 }
  0x93   : > { %v436_v40 = vpop.permute.xlu1 %435 }
  0x94   : > { %v426_v39 = vpop.permute.xlu0 %425 }
  0x97   : > { %v446_v42 = vpop.permute.xlu1 %445 }
  0x98   : > { %v441_v41 = vpop.permute.xlu0 %440 }
  0x9b   : > { %v456_v47 = vpop.permute.xlu1 %455 }
  0x9c   : > { %v451_v43 = vpop.permute.xlu0 %450 }
  0x9f   : > { %v466_v59 = vpop.permute.xlu1 %465 }
  0xa0   : > { %v461_v55 = vpop.permute.xlu0 %460 }
  0xa3   : > { %v476_v8 = vpop.permute.xlu1 %475 }
  0xa4   : > { %v471_v5 = vpop.permute.xlu0 %470 }
  0xa7   : > { %v486_v23 = vpop.permute.xlu1 %485 }
  0xa8   : > { %v481_v17 = vpop.permute.xlu0 %480 }
  0xab   : > { %v496_v34 = vpop.permute.xlu1 %495 }
  0xac   : > { %v491_v29 = vpop.permute.xlu0 %490 }
  0xf5   : > { %v1391_v44 = vpop.f32.mrb[0].mxu0 }
  0xf6   : > { %v610_v45 = vadd.f32 %v1391_v44, %v431_v38  ;;  %v601_v46 = vpop.f32.mrb[1].mxu0 }
  0xf7   : > { %v602_v48 = vadd.f32 %v601_v46, %v421_v37  ;;  %v1392_v49 = vpop.f32.mrb[2].mxu0 }
  0xf8   : > { %v666_v50 = vmax.f32 %v610_v45, 0.0  ;;  %v613_v51 = vadd.f32 %v1392_v49, %v436_v40  ;;  %v604_v52 = vpop.f32.mrb[3].mxu0  ;;  %v841_v49 = vld [vmem:[%s359_s17] sm:$0xf] }
  0xf9   : > { %v605_v53 = vadd.f32 %v604_v52, %v426_v39  ;;  %v664_v56 = vmax.f32 %v602_v48, 0.0  ;;  %v762_v52 = vld [vmem:[%s1782_s16 + $0x10] sm:$0xff] }
  0xfa   : > { %v667_v54 = vmax.f32 %v613_v51, 0.0  ;;  %780 = vadd.xlane.f32.xlu0 %v666_v50 }
  0xfb   : > { %v665_v57 = vmax.f32 %v605_v53, 0.0 }
  0xfc   : > { %v1330_v58 = vpack.c.bf16 %v667_v54, %v666_v50 }
  0xfd   : > { %v1325_v60 = vpack.c.bf16 %v665_v57, %v664_v56  ;;  %v1395_v61 = vpop.f32.mrb[4].mxu0  ;;  %778 = vadd.xlane.f32.xlu1 %v665_v57 }
  0xfe   : > { %1362 = vst [vmem:[%s1833_s21 + $0x8] sm:$0xff] %v1330_v58   ;;  %v626_v62 = vadd.f32 %v1395_v61, %v451_v43  ;;  %v617_v63 = vpop.f32.mrb[5].mxu0  ;;  %776 = vadd.xlane.f32.xlu0 %v664_v56  ;;  %v760_v56 = vld [vmem:[%s1782_s16] sm:$0xff]  ;;  %v763_v61 = vld [vmem:[%s1782_s16 + $0x18] sm:$0xff] }
  0xff   : > { %1326 = vst [vmem:[%s1833_s21] sm:$0xff] %v1325_v60   ;;  %v618_v0 = vadd.f32 %v617_v63, %v441_v41  ;;  %v1396_v1 = vpop.f32.mrb[6].mxu0  ;;  %v766_v60 = vld [vmem:[%s1782_s16 + $0x30] sm:$0xff] }
 0x100   : > { %v670_v2 = vmax.f32 %v626_v62, 0.0  ;;  %v629_v3 = vadd.f32 %v1396_v1, %v456_v47  ;;  %v620_v4 = vpop.f32.mrb[7].mxu0 }
 0x101   : > { %v621_v6 = vadd.f32 %v620_v4, %v446_v42  ;;  %v668_v9 = vmax.f32 %v618_v0, 0.0 }
 0x102   : > { %v671_v7 = vmax.f32 %v629_v3, 0.0  ;;  %788 = vadd.xlane.f32.xlu1 %v670_v2  ;;  %782 = vadd.xlane.f32.xlu0 %v667_v54  ;;  %v767_v3 = vld [vmem:[%s1782_s16 + $0x38] sm:$0xff] }
 0x103   : > { %v669_v11 = vmax.f32 %v621_v6, 0.0 }
 0x104   : > { %v1340_v12 = vpack.c.bf16 %v671_v7, %v670_v2  ;;  %v764_v2 = vld [vmem:[%s1782_s16 + $0x20] sm:$0xff] }
 0x105   : > { %v1335_v13 = vpack.c.bf16 %v669_v11, %v668_v9  ;;  %v1399_v14 = vpop.f32.mrb[8].mxu0 }
 0x106   : > { %1364 = vst [vmem:[%s1833_s21 + $0x18] sm:$0xff] %v1340_v12   ;;  %v642_v15 = vadd.f32 %v1399_v14, %v471_v5  ;;  %v633_v16 = vpop.f32.mrb[9].mxu0  ;;  %784 = vadd.xlane.f32.xlu1 %v668_v9  ;;  %790 = vadd.xlane.f32.xlu0 %v671_v7  ;;  %v765_v9 = vld [vmem:[%s1782_s16 + $0x28] sm:$0xff] }
 0x107   : > { %1363 = vst [vmem:[%s1833_s21 + $0x10] sm:$0xff] %v1335_v13   ;;  %v634_v18 = vadd.f32 %v633_v16, %v461_v55  ;;  %v1400_v19 = vpop.f32.mrb[10].mxu0  ;;  %v761_v55 = vld [vmem:[%s1782_s16 + $0x8] sm:$0xff]  ;;  %v771_v16 = vld [vmem:[%s1782_s16 + $0x58] sm:$0xff] }
 0x108   : > { %v674_v20 = vmax.f32 %v642_v15, 0.0  ;;  %v645_v21 = vadd.f32 %v1400_v19, %v476_v8  ;;  %v636_v22 = vpop.f32.mrb[11].mxu0  ;;  %v770_v8 = vld [vmem:[%s1782_s16 + $0x50] sm:$0xff]  ;;  %v768_v15 = vld [vmem:[%s1782_s16 + $0x40] sm:$0xff] }
 0x109   : > { %v637_v24 = vadd.f32 %v636_v22, %v466_v59  ;;  %v672_v26 = vmax.f32 %v634_v18, 0.0  ;;  %v772_v22 = vld [vmem:[%s1782_s16 + $0x60] sm:$0xff] }
 0x10a   : > { %v675_v25 = vmax.f32 %v645_v21, 0.0  ;;  %796 = vadd.xlane.f32.xlu1 %v674_v20  ;;  %786 = vadd.xlane.f32.xlu0 %v669_v11  ;;  %v769_v21 = vld [vmem:[%s1782_s16 + $0x48] sm:$0xff] }
 0x10b   : > { %v673_v27 = vmax.f32 %v637_v24, 0.0 }
 0x10c   : > { %v1350_v28 = vpack.c.bf16 %v675_v25, %v674_v20 }
 0x10d   : > { %v1345_v30 = vpack.c.bf16 %v673_v27, %v672_v26  ;;  %v1403_v31 = vpop.f32.mrb[12].mxu0 }
 0x10e   : > { %1366 = vst [vmem:[%s1833_s21 + $0x28] sm:$0xff] %v1350_v28   ;;  %v658_v32 = vadd.f32 %v1403_v31, %v491_v29  ;;  %v649_v33 = vpop.f32.mrb[13].mxu0  ;;  %792 = vadd.xlane.f32.xlu1 %v672_v26  ;;  %798 = vadd.xlane.f32.xlu0 %v675_v25  ;;  %v774_v28 = vld [vmem:[%s1782_s16 + $0x70] sm:$0xff] }
 0x10f   : > { %1365 = vst [vmem:[%s1833_s21 + $0x20] sm:$0xff] %v1345_v30   ;;  %v650_v35 = vadd.f32 %v649_v33, %v481_v17  ;;  %v1404_v36 = vpop.f32.mrb[14].mxu0  ;;  %v775_v33 = vld [vmem:[%s1782_s16 + $0x78] sm:$0xff] }
 0x110   : > { %v661_v37 = vadd.f32 %v1404_v36, %v496_v34  ;;  %v652_v38 = vpop.f32.mrb[15].mxu0  ;;  %v678_v41 = vmax.f32 %v658_v32, 0.0  ;;  %v993_v36 = vld [vmem:[%s1833_s21] sm:$0xf] (%p1643_p5) }
 0x111   : > { %v676_v39 = vmax.f32 %v650_v35, 0.0  ;;  %v653_v40 = vadd.f32 %v652_v38, %v486_v23  ;;  %v997_v38 = vld [vmem:[%s1833_s21 + $0x8] sm:$0xf] (%p1643_p5)  ;;  %994 = vst [vmem:[%s977_s20] sm:$0xf] (%p1643_p5), %v993_v36 }
 0x112   : > { %v679_v42 = vmax.f32 %v661_v37, 0.0  ;;  %794 = vadd.xlane.f32.xlu0 %v673_v27  ;;  %v773_v27 = vld [vmem:[%s1782_s16 + $0x68] sm:$0xff]  ;;  %v995_v37 = vld [vmem:[%s1833_s21 + $0x4] sm:$0xf] (%p1643_p5)  ;;  %998 = vst [vmem:[%s977_s20 + $0x10] sm:$0xf] (%p1643_p5), %v997_v38 }
 0x113   : > { %v677_v43 = vmax.f32 %v653_v40, 0.0  ;;  %800 = vadd.xlane.f32.xlu1 %v676_v39  ;;  %v940_v46 = vpop.f32.mrb[0].mxu1  ;;  %v1001_v40 = vld [vmem:[%s1833_s21 + $0x10] sm:$0xf] (%p1643_p5)  ;;  %996 = vst [vmem:[%s977_s20 + $0x8] sm:$0xf] (%p1643_p5), %v995_v37 }
 0x114   : > { %v1360_v44 = vpack.c.bf16 %v679_v42, %v678_v41  ;;  %v1423_v47 = vpop.f32.mrb[1].mxu1  ;;  %v946_v51 = vadd.f32 %v940_v46, %v841_v49  ;;  %1002 = vst [vmem:[%s977_s20 + $0x20] sm:$0xf] (%p1643_p5), %v1001_v40 }
 0x115   : > { %v1355_v45 = vpack.c.bf16 %v677_v43, %v676_v39  ;;  %v943_v48 = vpop.f32.mrb[2].mxu1  ;;  %v999_v39 = vld [vmem:[%s1833_s21 + $0xc] sm:$0xf] (%p1643_p5)  ;;  %v1013_v46 = vld [vmem:[%s1833_s21 + $0x28] sm:$0xf] (%p1643_p5) }
 0x116   : > { %1368 = vst [vmem:[%s1833_s21 + $0x38] sm:$0xff] %v1360_v44   ;;  %802 = vadd.xlane.f32.xlu0 %v677_v43  ;;  %v1424_v50 = vpop.f32.mrb[3].mxu1  ;;  %948 = vst.msk [vmem:[%s359_s17] sm:$0xf] %vm382_vm4, %v946_v51  ;;  %v1007_v43 = vld [vmem:[%s1833_s21 + $0x1c] sm:$0xf] (%p1643_p5) }
 0x117   : > { %1367 = vst [vmem:[%s1833_s21 + $0x30] sm:$0xff] %v1355_v45   ;;  %804 = vadd.xlane.f32.xlu1 %v678_v41  ;;  %v1003_v41 = vld [vmem:[%s1833_s21 + $0x14] sm:$0xf] (%p1643_p5)  ;;  %v1009_v44 = vld [vmem:[%s1833_s21 + $0x20] sm:$0xf] (%p1643_p5) }
 0x118   : > { %v1011_v45 = vld [vmem:[%s1833_s21 + $0x24] sm:$0xf] (%p1643_p5)  ;;  %1000 = vst [vmem:[%s977_s20 + $0x18] sm:$0xf] (%p1643_p5), %v999_v39  ;;  %1004 = vst [vmem:[%s977_s20 + $0x28] sm:$0xf] (%p1643_p5), %v1003_v41 }
 0x119   : > { %1008 = vst [vmem:[%s977_s20 + $0x38] sm:$0xf] (%p1643_p5), %v1007_v43  ;;  %1010 = vst [vmem:[%s977_s20 + $0x40] sm:$0xf] (%p1643_p5), %v1009_v44  ;;  %v1015_v47 = vld [vmem:[%s1833_s21 + $0x2c] sm:$0xf] (%p1643_p5) }
 0x11a   : > { %806 = vadd.xlane.f32.xlu0 %v679_v42  ;;  %v1005_v42 = vld [vmem:[%s1833_s21 + $0x18] sm:$0xf] (%p1643_p5)  ;;  %1012 = vst [vmem:[%s977_s20 + $0x48] sm:$0xf] (%p1643_p5), %v1011_v45  ;;  %1014 = vst [vmem:[%s977_s20 + $0x50] sm:$0xf] (%p1643_p5), %v1013_v46 }
 0x11b   : > { %1006 = vst [vmem:[%s977_s20 + $0x30] sm:$0xf] (%p1643_p5), %v1005_v42  ;;  %1016 = vst [vmem:[%s977_s20 + $0x58] sm:$0xf] (%p1643_p5), %v1015_v47 }
 0x11d   : > { %v1021_v50 = vld [vmem:[%s1833_s21 + $0x38] sm:$0xf] (%p1643_p5)  ;;  %v1023_v51 = vld [vmem:[%s1833_s21 + $0x3c] sm:$0xf] (%p1643_p5) }
 0x11e   : > { %v1017_v48 = vld [vmem:[%s1833_s21 + $0x30] sm:$0xf] (%p1643_p5)  ;;  %v1019_v49 = vld [vmem:[%s1833_s21 + $0x34] sm:$0xf] (%p1643_p5)  ;;  %1022 = vst [vmem:[%s977_s20 + $0x70] sm:$0xf] (%p1643_p5), %v1021_v50 }
 0x11f   : > { %1018 = vst [vmem:[%s977_s20 + $0x60] sm:$0xf] (%p1643_p5), %v1017_v48  ;;  %1020 = vst [vmem:[%s977_s20 + $0x68] sm:$0xf] (%p1643_p5), %v1019_v49 }
 0x120   : > { %1024 = vst [vmem:[%s977_s20 + $0x78] sm:$0xf] (%p1643_p5), %v1023_v51 }
 0x187   : > { %v781_v53 = vpop.xlane.xlu0 %780 }
 0x188   : > { %v810_v54 = vadd.f32 %v781_v53, %v762_v52 }
 0x18a   : > { %827 = vst.msk [vmem:[%s1782_s16 + $0x10] sm:$0xff] %vm365_vm3, %v810_v54  ;;  %v779_v10 = vpop.xlane.xlu1 %778 }
 0x18b   : > { %v809_v57 = vadd.f32 %v779_v10, %v761_v55  ;;  %v777_v58 = vpop.xlane.xlu0 %776 }
 0x18c   : > { %v808_v59 = vadd.f32 %v777_v58, %v760_v56 }
 0x18d   : > { %826 = vst.msk [vmem:[%s1782_s16 + $0x8] sm:$0xff] %vm365_vm3, %v809_v57 }
 0x18e   : > { %825 = vst.msk [vmem:[%s1782_s16] sm:$0xff] %vm365_vm3, %v808_v59 }
 0x18f   : > { %v789_v62 = vpop.xlane.xlu1 %788  ;;  %v783_v63 = vpop.xlane.xlu0 %782 }
 0x190   : > { %v814_v0 = vadd.f32 %v789_v62, %v766_v60  ;;  %v811_v1 = vadd.f32 %v783_v63, %v763_v61 }
 0x192   : > { %831 = vst.msk [vmem:[%s1782_s16 + $0x30] sm:$0xff] %vm365_vm3, %v814_v0  ;;  %828 = vst.msk [vmem:[%s1782_s16 + $0x18] sm:$0xff] %vm365_vm3, %v811_v1 }
 0x193   : > { %v785_v4 = vpop.xlane.xlu1 %784  ;;  %v791_v5 = vpop.xlane.xlu0 %790 }
 0x194   : > { %v812_v6 = vadd.f32 %v785_v4, %v764_v2  ;;  %v815_v7 = vadd.f32 %v791_v5, %v767_v3 }
 0x196   : > { %829 = vst.msk [vmem:[%s1782_s16 + $0x20] sm:$0xff] %vm365_vm3, %v812_v6  ;;  %832 = vst.msk [vmem:[%s1782_s16 + $0x38] sm:$0xff] %vm365_vm3, %v815_v7 }
 0x197   : > { %v797_v11 = vpop.xlane.xlu1 %796  ;;  %v787_v12 = vpop.xlane.xlu0 %786 }
 0x198   : > { %v818_v13 = vadd.f32 %v797_v11, %v770_v8  ;;  %v813_v14 = vadd.f32 %v787_v12, %v765_v9 }
 0x19a   : > { %835 = vst.msk [vmem:[%s1782_s16 + $0x50] sm:$0xff] %vm365_vm3, %v818_v13  ;;  %830 = vst.msk [vmem:[%s1782_s16 + $0x28] sm:$0xff] %vm365_vm3, %v813_v14 }
 0x19b   : > { %v793_v17 = vpop.xlane.xlu1 %792  ;;  %v799_v18 = vpop.xlane.xlu0 %798 }
 0x19c   : > { %v816_v19 = vadd.f32 %v793_v17, %v768_v15  ;;  %v819_v20 = vadd.f32 %v799_v18, %v771_v16 }
 0x19e   : > { %833 = vst.msk [vmem:[%s1782_s16 + $0x40] sm:$0xff] %vm365_vm3, %v816_v19  ;;  %836 = vst.msk [vmem:[%s1782_s16 + $0x58] sm:$0xff] %vm365_vm3, %v819_v20 }
 0x19f   : > { %v795_v23 = vpop.xlane.xlu0 %794 }
 0x1a0   : > { %v817_v24 = vadd.f32 %v795_v23, %v769_v21  ;;  %v801_v25 = vpop.xlane.xlu1 %800 }
 0x1a1   : > { %v820_v26 = vadd.f32 %v801_v25, %v772_v22 }
 0x1a2   : > { %834 = vst.msk [vmem:[%s1782_s16 + $0x48] sm:$0xff] %vm365_vm3, %v817_v24 }
 0x1a3   : > { %837 = vst.msk [vmem:[%s1782_s16 + $0x60] sm:$0xff] %vm365_vm3, %v820_v26  ;;  %v803_v29 = vpop.xlane.xlu0 %802 }
 0x1a4   : > { %v821_v30 = vadd.f32 %v803_v29, %v773_v27  ;;  %v805_v31 = vpop.xlane.xlu1 %804  ;;  %972 = sbr.rel (!%p1643_p5) target bundleno = 427 (0x1ab), region = 44 }
 0x1a5   : > { %v822_v32 = vadd.f32 %v805_v31, %v774_v28 }
 0x1a6   : > { %838 = vst.msk [vmem:[%s1782_s16 + $0x68] sm:$0xff] %vm365_vm3, %v821_v30 }
 0x1a7   : > { %839 = vst.msk [vmem:[%s1782_s16 + $0x70] sm:$0xff] %vm365_vm3, %v822_v32  ;;  %v807_v34 = vpop.xlane.xlu0 %806 }
 0x1a8   : > { %v823_v35 = vadd.f32 %v807_v34, %v775_v33 }
 0x1aa   : > { %840 = vst.msk [vmem:[%s1782_s16 + $0x78] sm:$0xff] %vm365_vm3, %v823_v35 }
 0x1ab PF: > { %s17_s27 = sadd.s32 1, %s1557_s27   ;;  %s1949_s21 = smov %s1537_s22 }
 0x1ac   : > { %p14_p12 = scmp.ge.s32.totalorder %s17_s27, 6   ;;  %s1950_s22 = smov %s1654_s12 }
 0x1ad   : > { %s1951_s23 = smov %s1549_s25  ;;  %s1952_s24 = smov %s1553_s26 }
 0x1ae   : > { %s1953_s25 = smov %s1956_s28  ;;  %s1954_s26 = smov %s1960_s29 }
 0x1af   :  { %16 = sbr.rel (!%p14_p12) target bundleno = 4 (0x4), region = 138 }

// kernel: adaptive_context_module.3
= control target key start
LH: loop header
LB: loop body
LE: loop exit
PB: predicated region body
PF: predicated region fallthrough
CT: control target
= control target key end

     0   :  { %s2021_s0 = inlined_call_operand.vmem [shape: bf16[2,128,256], index: 0, kind: input, shape index: {}]   ;;  %s2022_s1 = inlined_call_operand.vmem [shape: f32[2,8,1], index: 1, kind: input, shape index: {}]   ;;  %s2023_s2 = inlined_call_operand.vmem [shape: bf16[2,128,8], index: 2, kind: input, shape index: {}]   ;;  %s2024_s3 = inlined_call_operand.vmem [shape: bf16[8,128], index: 3, kind: input, shape index: {}]   ;;  %s2025_s4 = inlined_call_operand.vmem [shape: bf16[128,128], index: 4, kind: input, shape index: {}]   ;;  %s2026_s5 = inlined_call_operand.vmem [shape: bf16[32,128], index: 5, kind: input, shape index: {}]   ;;  %s2027_s6 = inlined_call_operand.vmem [shape: f32[128,1], index: 6, kind: input, shape index: {}]   ;;  %s2028_s7 = inlined_call_operand.vmem [shape: f32[32,1], index: 7, kind: input, shape index: {}]   ;;  %s2029_s8 = inlined_call_operand.vmem [shape: f32[2,32,256], index: 8, kind: output, shape index: {}]  }
   0x1   :  { %2031 = sst [smem:[#allocation4_spill]] %s2021_s0 }
   0x2   :  { %s1734_s27 = smov 0   ;;  %s1736_s28 = smov 0  }
   0x3   :  { %s1738_s29 = smov 0   ;;  %s1740_s30 = smov 0  }
   0x4   :  { %s1742_s9 = smov 0   ;;  %s1744_s10 = smov 0  }
   0x5   :  { %s1746_s11 = smov 0  }
   0x6 LB: > { %s27_s12 = sadd.s32 1, %s1676_s9  ;;  %s30_s13 = sadd.s32 1, %s1680_s10  ;;  %s1684_s11 = sphi %s1746_s11, %s18_s11   ;;  %s1680_s10 = sphi %s1744_s10, %s2040_s10   ;;  %s1676_s9 = sphi %s1742_s9, %s2039_s9   ;;  %s1672_s30 = sphi %s1740_s30, %s2038_s30   ;;  %s1668_s29 = sphi %s1738_s29, %s2037_s29   ;;  %s1664_s28 = sphi %s1736_s28, %s2036_s28   ;;  %s1660_s27 = sphi %s1734_s27, %s2035_s27  }
   0x7   : > { %p28_p0 = scmp.ge.s32.totalorder %s27_s12, 2  ;;  %s1342_s14 = sadd.s32 4294967295, %s1684_s11  }
   0x8   : > { %p46_p1 = scmp.ne.s32.totalorder %s1664_s28, %s1660_s27  ;;  %p47_p2 = scmp.eq.s32.totalorder %s1684_s11, 0 }
   0x9   : > { %s2042_s12 = smov (%p28_p0, %s27_s12), 0  ;;  %s2044_s13 = smov (!%p28_p0, %s30_s13), %s1680_s10 }
   0xa   : > { %p32_p3 = scmp.ge.s32.totalorder %s2044_s13, 2  ;;  %p235_p4 = scmp.eq.s32.totalorder %s1342_s14, 3 }
   0xb   : > { %s35_s15 = ssub.s32 %s1676_s9, %s2042_s12  ;;  %p48_p5 = por %p47_p2, %p46_p1 }
   0xc   : > { %s2046_s13 = smov (%p32_p3, %s2044_s13), 0  ;;  %p1782_p6 = por %p235_p4, %p46_p1 }
   0xd   : > { %s34_s17 = ssub.s32 %s1680_s10, %s2046_s13  ;;  %s39_s19 = sadd.s32 1, %s1664_s28 }
   0xe   : > { %s36_s18 = sor.u32 %s35_s15, %s34_s17  ;;  %p1345_p8 = scmp.ge.s32.totalorder %s1684_s11, 4 }
   0xf   : > { %p37_p7 = scmp.eq.s32.totalorder %s36_s18, 0 }
  0x10   : > { %272 = sbr.rel (%p1345_p8) target bundleno = 43 (0x2b), region = 36 }
  0x11   : > { %s1790_s20 = scalar_select %p37_p7, %s1664_s28, %s39_s19  }
  0x17   : > { %275 = sbr.rel (!%p48_p5) target bundleno = 43 (0x2b), region = 40  ;;  %s277_s21 = sand.u32 (%p48_p5), 1, %s1664_s28  }
  0x18   : > { %s1347_s22 = sshll.u32 (%p48_p5), %s1680_s10, 5  ;;  %s1346_s23 = sshll.u32 (%p48_p5), %s277_s21, 6 }
  0x19   : > { %s281_s24 = sadd.s32 (%p48_p5), %s1676_s9, %s1347_s22  ;;  %s2033_s0 = sld [smem:[#allocation4_spill]] (%p48_p5) }
  0x1a   : > { %s1348_s25 = sshll.u32 (%p48_p5), %s281_s24, 2  ;;  %s279_s17 = scalar_lea.vmem (%p48_p5), [#allocation2], %s1346_s23 }
  0x1f   : > { %s1799_s15 = scalar_lea.vmem %s2033_s0, %s1348_s25 }
  0x20   : > { %v299_v0 = vld [vmem:[%s1799_s15] sm:$0xf]  ;;  %v301_v1 = vld [vmem:[%s1799_s15 + $0x8] sm:$0xf]  ;;  %v303_v2 = vld [vmem:[%s1799_s15 + $0x10] sm:$0xf] }
  0x21   : > { %300 = vst [vmem:[%s279_s17] sm:$0xf] %v299_v0  ;;  %302 = vst [vmem:[%s279_s17 + $0x4] sm:$0xf] %v301_v1  ;;  %v305_v3 = vld [vmem:[%s1799_s15 + $0x18] sm:$0xf] }
  0x22   : > { %304 = vst [vmem:[%s279_s17 + $0x8] sm:$0xf] %v303_v2  ;;  %v307_v4 = vld [vmem:[%s1799_s15 + $0x20] sm:$0xf]  ;;  %v309_v5 = vld [vmem:[%s1799_s15 + $0x28] sm:$0xf] }
  0x23   : > { %306 = vst [vmem:[%s279_s17 + $0xc] sm:$0xf] %v305_v3  ;;  %308 = vst [vmem:[%s279_s17 + $0x10] sm:$0xf] %v307_v4  ;;  %v311_v6 = vld [vmem:[%s1799_s15 + $0x30] sm:$0xf] }
  0x24   : > { %310 = vst [vmem:[%s279_s17 + $0x14] sm:$0xf] %v309_v5  ;;  %v313_v7 = vld [vmem:[%s1799_s15 + $0x38] sm:$0xf]  ;;  %v315_v8 = vld [vmem:[%s1799_s15 + $0x40] sm:$0xf] }
  0x25   : > { %312 = vst [vmem:[%s279_s17 + $0x18] sm:$0xf] %v311_v6  ;;  %314 = vst [vmem:[%s279_s17 + $0x1c] sm:$0xf] %v313_v7  ;;  %v317_v9 = vld [vmem:[%s1799_s15 + $0x48] sm:$0xf] }
  0x26   : > { %316 = vst [vmem:[%s279_s17 + $0x20] sm:$0xf] %v315_v8  ;;  %v319_v10 = vld [vmem:[%s1799_s15 + $0x50] sm:$0xf]  ;;  %v321_v11 = vld [vmem:[%s1799_s15 + $0x58] sm:$0xf] }
  0x27   : > { %318 = vst [vmem:[%s279_s17 + $0x24] sm:$0xf] %v317_v9  ;;  %320 = vst [vmem:[%s279_s17 + $0x28] sm:$0xf] %v319_v10  ;;  %v323_v12 = vld [vmem:[%s1799_s15 + $0x60] sm:$0xf] }
  0x28   : > { %322 = vst [vmem:[%s279_s17 + $0x2c] sm:$0xf] %v321_v11  ;;  %v325_v13 = vld [vmem:[%s1799_s15 + $0x68] sm:$0xf]  ;;  %v327_v14 = vld [vmem:[%s1799_s15 + $0x70] sm:$0xf] }
  0x29   : > { %324 = vst [vmem:[%s279_s17 + $0x30] sm:$0xf] %v323_v12  ;;  %326 = vst [vmem:[%s279_s17 + $0x34] sm:$0xf] %v325_v13  ;;  %v329_v15 = vld [vmem:[%s1799_s15 + $0x78] sm:$0xf] }
  0x2a   : > { %328 = vst [vmem:[%s279_s17 + $0x38] sm:$0xf] %v327_v14  ;;  %330 = vst [vmem:[%s279_s17 + $0x3c] sm:$0xf] %v329_v15 }
  0x2b PF: > { %p1349_p9 = scmp.ge.s32.totalorder %s1684_s11, 1  ;;  %p399_p10 = scmp.lt.s32.totalorder %s1684_s11, 5 }
  0x2d   : > { %p400_p11 = pnand %p1349_p9, %p399_p10 }
  0x2e   : > { %s2030_s18 = sand.u32 (!%p400_p11), 1, %s1660_s27   ;;  %v1686_v16 = vmov (!%p400_p11), 0.0   ;;  %vm1687_vm0 = vmmov (!%p400_p11), 0   ;;  %p447_p12 = scmp.lt.s32.totalorder (!%p400_p11), %s1672_s30, 1  ;;  %v1688_v17 = vmov (!%p400_p11), 0   ;;  %v781_v22 = vld [vmem:[%s2027_s6] sm:$0xff] (!%p400_p11) }
  0x2f   : > { %403 = sbr.rel (%p400_p11) target bundleno = 1061 (0x425), region = 89  ;;  %1440 = vmatprep.subr.bf16.mxu0 (!%p400_p11), %v1686_v16  ;;  %s1350_s19 = sshll.u32 (!%p400_p11), %s2030_s18, 6  ;;  %1456 = vmatprep.mubr.msk.bf16.mxu0 (!%p400_p11), %vm1687_vm0, %v1686_v16  ;;  %v784_v24 = vld [vmem:[%s2027_s6 + $0x18] sm:$0xff] (!%p400_p11)  ;;  %v786_v26 = vld [vmem:[%s2027_s6 + $0x28] sm:$0xff] (!%p400_p11)  ;;  %v473_v34 = vld [vmem:[%s2024_s3] sm:$0xf] (!%p400_p11) }
  0x30   : > { %1590 = vset.pattern.permute.xlu0 (!%p400_p11), %v1688_v17  ;;  %1591 = vset.pattern.permute.xlu1 (!%p400_p11), %v1688_v17  ;;  %s1823_s21 = scalar_lea.vmem (!%p400_p11), [#allocation2], %s1350_s19  ;;  %v788_v28 = vld [vmem:[%s2027_s6 + $0x38] sm:$0xff] (!%p400_p11)  ;;  %v790_v30 = vld [vmem:[%s2027_s6 + $0x48] sm:$0xff] (!%p400_p11)  ;;  %vm631_vm1 = vcmask (!%p400_p11), 64512   ;;  %vm656_vm2 = vcmask (!%p400_p11), 1043456   ;;  %v1608_v58 = vld [vmem:[%s2025_s4] sm:$0xff] (!%p400_p11)  }
  0x31   : > { %v1826_v18 = vld [vmem:[%s1823_s21] sm:$0xff] (!%p400_p11)   ;;  %v1829_v19 = vld [vmem:[%s1823_s21 + $0x8] sm:$0xff] (!%p400_p11)   ;;  %v1834_v20 = vld [vmem:[%s1823_s21 + $0x10] sm:$0xff] (!%p400_p11)   ;;  %s2034_s18 = sand.u32 (!%p400_p11), 1, %s1660_s27  }
  0x32   : > { %1441 = vmatpush3.bf16.msra.mxu0 (!%p400_p11), %v1826_v18  ;;  %v1848_v23 = vld [vmem:[%s1823_s21 + $0x18] sm:$0xff] (!%p400_p11)   ;;  %v1855_v25 = vld [vmem:[%s1823_s21 + $0x20] sm:$0xff] (!%p400_p11)   ;;  %v1863_v27 = vld [vmem:[%s1823_s21 + $0x28] sm:$0xff] (!%p400_p11)  }
  0x33   : > { %1442 = vmatprep.subr.bf16.mxu0 (!%p400_p11), %v1686_v16  ;;  %v1870_v29 = vld [vmem:[%s1823_s21 + $0x30] sm:$0xff] (!%p400_p11)   ;;  %v1877_v31 = vld [vmem:[%s1823_s21 + $0x38] sm:$0xff] (!%p400_p11)   ;;  %v794_v33 = vld [vmem:[%s2027_s6 + $0x68] sm:$0xff] (!%p400_p11)  ;;  %s1351_s21 = sshll.u32 (!%p400_p11), %s2034_s18, 5 }
  0x34   : > { %v792_v32 = vld [vmem:[%s2027_s6 + $0x58] sm:$0xff] (!%p400_p11)  ;;  %v1099_v36 = vld [vmem:[%s2028_s7 + $0x8] sm:$0xff] (!%p400_p11)  ;;  %v783_v60 = vld [vmem:[%s2027_s6 + $0x10] sm:$0xff] (!%p400_p11) }
  0x35   : > { %v796_v35 = vld [vmem:[%s2027_s6 + $0x78] sm:$0xff] (!%p400_p11)  ;;  %v782_v59 = vld [vmem:[%s2027_s6 + $0x8] sm:$0xff] (!%p400_p11)  ;;  %v785_v61 = vld [vmem:[%s2027_s6 + $0x20] sm:$0xff] (!%p400_p11) }
  0x36   : > { %s448_s22 = scalar_select %p447_p12, %s1672_s30, 1  ;;  %1443 = vmatpush3.bf16.msra.mxu0 %v1829_v19  ;;  %v1101_v37 = vld [vmem:[%s2028_s7 + $0x18] sm:$0xff]  ;;  %804 = vperm.xlu1 %1591, %v782_v59   ;;  %v787_v62 = vld [vmem:[%s2027_s6 + $0x30] sm:$0xff]  ;;  %v789_v63 = vld [vmem:[%s2027_s6 + $0x40] sm:$0xff] }
  0x37   : > { %1444 = vmatprep.subr.bf16.mxu0 %v1686_v16  ;;  %v791_v0 = vld [vmem:[%s2027_s6 + $0x50] sm:$0xff]  ;;  %v793_v1 = vld [vmem:[%s2027_s6 + $0x60] sm:$0xff]  ;;  %s1391_s27 = sshll.u32 (%p1782_p6), %s1672_s30, 3 }
  0x38   : > { %s1352_s23 = sshll.u32 %s448_s22, 3  ;;  %s1395_s24 = sshll.u32 %s448_s22, 6  ;;  %v795_v2 = vld [vmem:[%s2027_s6 + $0x70] sm:$0xff]  ;;  %v1098_v3 = vld [vmem:[%s2028_s7] sm:$0xff] }
  0x39   : > { %s450_s14 = scalar_lea.vmem %s2022_s1, %s1352_s23  ;;  %s1842_s19 = scalar_lea.vmem %s2023_s2, %s1395_s24  ;;  %v1100_v4 = vld [vmem:[%s2028_s7 + $0x10] sm:$0xff] }
  0x3a   : > { %v474_v21 = vld [vmem:[%s450_s14] sm:$0xff]  ;;  %1445 = vmatpush3.bf16.msra.mxu0 %v1834_v20  ;;  %v1601_v51 = vld [vmem:[%s1842_s19 + $0x8] sm:$0xff]   ;;  %v1602_v52 = vld [vmem:[%s1842_s19 + $0x10] sm:$0xff]   ;;  %809 = vperm.xlu1 %1591, %v783_v60   ;;  %s446_s24 = scalar_lea.vmem [#allocation3], %s1351_s21  ;;  %s1199_s25 = sadd.s32 (%p1782_p6), %s1668_s29, %s1391_s27 }
  0x3b   : > { %477 = vperm.xlu0 %1590, %v474_v21   ;;  %1446 = vmatprep.subr.bf16.mxu0 %v1686_v16  ;;  %v1600_v38 = vld [vmem:[%s1842_s19] sm:$0xff]   ;;  %v1603_v53 = vld [vmem:[%s1842_s19 + $0x18] sm:$0xff]   ;;  %v1605_v55 = vld [vmem:[%s1842_s19 + $0x28] sm:$0xff]  }
  0x3c   : > { %1462 = vmatprep.mubr.msk.bf16.mxu1 %vm631_vm1, %v1600_v38  ;;  %v1604_v54 = vld [vmem:[%s1842_s19 + $0x20] sm:$0xff]   ;;  %v1606_v56 = vld [vmem:[%s1842_s19 + $0x30] sm:$0xff]   ;;  %v1607_v57 = vld [vmem:[%s1842_s19 + $0x38] sm:$0xff]   ;;  %s1392_s19 = sshll.u32 (%p1782_p6), %s1199_s25, 3 }
  0x3d   : > { %v1610_v38 = vld [vmem:[%s2025_s4 + $0x10] sm:$0xff]   ;;  %s1201_s15 = scalar_lea.vmem (%p1782_p6), %s2029_s8, %s1392_s19 }
  0x3e   : > { %1447 = vmatpush3.bf16.msra.mxu0 %v1848_v23  ;;  %819 = vperm.xlu1 %1591, %v785_v61  }
  0x3f   : > { %799 = vperm.xlu0 %1590, %v781_v22   ;;  %1448 = vmatprep.subr.bf16.mxu0 %v1686_v16 }
  0x42   : > { %1449 = vmatpush3.bf16.msra.mxu0 %v1855_v25  ;;  %829 = vperm.xlu1 %1591, %v787_v62   ;;  %v1041_v62 = vunpack.c.h.bf16 %v1829_v19 }
  0x43   : > { %814 = vperm.xlu0 %1590, %v784_v24   ;;  %1450 = vmatprep.subr.bf16.mxu0 %v1686_v16 }
  0x46   : > { %1451 = vmatpush3.bf16.msra.mxu0 %v1863_v27  ;;  %839 = vperm.xlu1 %1591, %v789_v63  }
  0x47   : > { %824 = vperm.xlu0 %1590, %v786_v26   ;;  %1452 = vmatprep.subr.bf16.mxu0 %v1686_v16 }
  0x4a   : > { %1453 = vmatpush3.bf16.msra.mxu0 %v1870_v29  ;;  %849 = vperm.xlu1 %1591, %v791_v0   ;;  %v1039_v0 = vunpack.c.h.bf16 %v1826_v18 }
  0x4b   : > { %834 = vperm.xlu0 %1590, %v788_v28   ;;  %1454 = vmatprep.subr.bf16.mxu0 %v1686_v16 }
  0x4e   : > { %1455 = vmatpush3.bf16.msra.mxu0 %v1877_v31  ;;  %859 = vperm.xlu1 %1591, %v793_v1  }
  0x4f   : > { %844 = vperm.xlu0 %1590, %v790_v30  }
  0x51   : > { %1457 = vmatmul.mubr.bf16.vlgmr.msra.gmra.mrb[0].mxu0 %v473_v34 }
  0x52   : > { %869 = vperm.xlu1 %1591, %v795_v2  }
  0x53   : > { %854 = vperm.xlu0 %1590, %v792_v32  }
  0x56   : > { %1104 = vperm.xlu1 %1591, %v1098_v3  }
  0x57   : > { %864 = vperm.xlu0 %1590, %v794_v33  }
  0x5a   : > { %1114 = vperm.xlu1 %1591, %v1100_v4  }
  0x5b   : > { %874 = vperm.xlu0 %1590, %v796_v35  }
  0x5f   : > { %1109 = vperm.xlu0 %1590, %v1099_v36  }
  0x63   : > { %1119 = vperm.xlu0 %1590, %v1101_v37   ;;  %v1609_v37 = vld [vmem:[%s2025_s4 + $0x8] sm:$0xff]  }
  0xba   : > { %v478_v39 = vpop.permute.xlu0 %477 }
 0x124   : > { %v562_v40 = vpop.f32.mrb[0].mxu0 }
 0x125   : > { %v563_v41 = vadd.f32 %v562_v40, %v478_v39  ;;  %v1458_v42 = vpop.f32.mrb[1].mxu0  ;;  %v1611_v39 = vld [vmem:[%s2025_s4 + $0x18] sm:$0xff]   ;;  %v1612_v40 = vld [vmem:[%s2025_s4 + $0x20] sm:$0xff]  }
 0x126   : > { %v565_v43 = vpop.f32.mrb[2].mxu0  ;;  %v1614_v42 = vld [vmem:[%s2025_s4 + $0x30] sm:$0xff]  }
 0x127   : > { %v1363_v44 = vmul.f32 -1.442695, %v563_v41  ;;  %v1459_v45 = vpop.f32.mrb[3].mxu0  ;;  %v1613_v41 = vld [vmem:[%s2025_s4 + $0x28] sm:$0xff]   ;;  %v1615_v43 = vld [vmem:[%s2025_s4 + $0x38] sm:$0xff]  }
 0x128   : > { %v805_v45 = vpop.permute.xlu1 %804 }
 0x129   : > { %1626 = vpow2.f32 %v1363_v44  ;;  %v1616_v44 = vld [vmem:[%s2026_s5] sm:$0xff]  }
 0x12a   : > { %1526 = vmatprep.mubr.bf16.mxu0 %v1616_v44 }
 0x133   : > { %v1627_v46 = vpop.eup %1626 }
 0x134   : > { %v571_v47 = vadd.f32 1.0, %v1627_v46  ;;  %v800_v46 = vpop.permute.xlu0 %799 }
 0x136   : > { %1628 = vrcp.f32 %v571_v47  ;;  %v810_v47 = vpop.permute.xlu1 %809 }
 0x140   : > { %v1629_v48 = vpop.eup %1628 }
 0x141   : > { %v590_v49 = vpack.c.bf16 %v1629_v48, %v1629_v48  ;;  %v815_v48 = vpop.permute.xlu0 %814 }
 0x143   : > { %1530 = vmatprep.subr.msk.bf16.mxu1 %vm656_vm2, %v590_v49  ;;  %v658_v50 = vsel %vm656_vm2, %v590_v49, 0  ;;  %v820_v49 = vpop.permute.xlu1 %819 }
 0x144   : > { %1461 = vmatpush3.bf16.msra.mxu1 %v658_v50 }
 0x145   : > { %v825_v50 = vpop.permute.xlu0 %824 }
 0x147   : > { %1463 = vmatmul.mubr.msk.bf16.vlgmr.msra.gmra.mrb[0].mxu1 %vm631_vm1, %v1601_v51  ;;  %v830_v51 = vpop.permute.xlu1 %829 }
 0x148   : > { %1466 = vmatprep.mubr.msk.bf16.mxu1 %vm631_vm1, %v1602_v52 }
 0x14f   : > { %1467 = vmatmul.mubr.msk.bf16.gmra.mrb[4].mxu1 %vm631_vm1, %v1603_v53 }
 0x150   : > { %1470 = vmatprep.mubr.msk.bf16.mxu1 %vm631_vm1, %v1604_v54  ;;  %v1040_v54 = vunpack.c.l.bf16 %v1829_v19 }
 0x157   : > { %1471 = vmatmul.mubr.msk.bf16.gmra.mrb[8].mxu1 %vm631_vm1, %v1605_v55 }
 0x158   : > { %1474 = vmatprep.mubr.msk.bf16.mxu1 %vm631_vm1, %v1606_v56  ;;  %v1038_v56 = vunpack.c.l.bf16 %v1826_v18 }
 0x15f   : > { %1475 = vmatmul.mubr.msk.bf16.gmra.mrb[12].mxu1 %vm631_vm1, %v1607_v57  ;;  %v835_v57 = vpop.permute.xlu0 %834 }
 0x160   : > { %1494 = vmatprep.mubr.bf16.mxu1 %v1608_v58 }
 0x21a   : > { %v1464_v5 = vpop.f32.mrb[0].mxu1 }
 0x21b   : > { %v694_v6 = vpop.f32.mrb[1].mxu1 }
 0x21c   : > { %v1465_v7 = vpop.f32.mrb[2].mxu1 }
 0x21d   : > { %v774_v8 = vpack.c.bf16 %v1465_v7, %v1464_v5  ;;  %v697_v9 = vpop.f32.mrb[3].mxu1  ;;  %v840_v5 = vpop.permute.xlu1 %839 }
 0x21e   : > { %v773_v10 = vpack.c.bf16 %v697_v9, %v694_v6  ;;  %v845_v9 = vpop.permute.xlu0 %844 }
 0x220   : > { %1478 = vmatprep.subr.bf16.mxu1 %v773_v10 }
 0x221   : > { %1479 = vmatpush3.bf16.msra.mxu1 %v773_v10 }
 0x222   : > { %v1468_v11 = vpop.f32.mrb[4].mxu1  ;;  %1480 = vmatprep.subr.bf16.mxu1 %v774_v8 }
 0x223   : > { %v710_v12 = vpop.f32.mrb[5].mxu1 }
 0x224   : > { %v1469_v13 = vpop.f32.mrb[6].mxu1 }
 0x225   : > { %v776_v14 = vpack.c.bf16 %v1469_v13, %v1468_v11  ;;  %v713_v15 = vpop.f32.mrb[7].mxu1  ;;  %1481 = vmatpush3.bf16.msra.mxu1 %v774_v8 }
 0x226   : > { %v775_v16 = vpack.c.bf16 %v713_v15, %v710_v12  ;;  %v1044_v15 = vunpack.c.l.bf16 %v1848_v23 }
 0x228   : > { %1482 = vmatprep.subr.bf16.mxu1 %v775_v16 }
 0x229   : > { %1483 = vmatpush3.bf16.msra.mxu1 %v775_v16 }
 0x22a   : > { %v1472_v17 = vpop.f32.mrb[8].mxu1  ;;  %1484 = vmatprep.subr.bf16.mxu1 %v776_v14 }
 0x22b   : > { %v726_v21 = vpop.f32.mrb[9].mxu1 }
 0x22c   : > { %v1473_v22 = vpop.f32.mrb[10].mxu1 }
 0x22d   : > { %v778_v24 = vpack.c.bf16 %v1473_v22, %v1472_v17  ;;  %v729_v26 = vpop.f32.mrb[11].mxu1  ;;  %1485 = vmatpush3.bf16.msra.mxu1 %v776_v14 }
 0x22e   : > { %v777_v28 = vpack.c.bf16 %v729_v26, %v726_v21  ;;  %v1042_v21 = vunpack.c.l.bf16 %v1834_v20 }
 0x230   : > { %1486 = vmatprep.subr.bf16.mxu1 %v777_v28 }
 0x231   : > { %1487 = vmatpush3.bf16.msra.mxu1 %v777_v28  ;;  %v1045_v28 = vunpack.c.h.bf16 %v1848_v23 }
 0x232   : > { %v1476_v30 = vpop.f32.mrb[12].mxu1  ;;  %1488 = vmatprep.subr.bf16.mxu1 %v778_v24 }
 0x233   : > { %v742_v32 = vpop.f32.mrb[13].mxu1 }
 0x234   : > { %v1477_v33 = vpop.f32.mrb[14].mxu1 }
 0x235   : > { %v780_v34 = vpack.c.bf16 %v1477_v33, %v1476_v30  ;;  %v745_v35 = vpop.f32.mrb[15].mxu1  ;;  %1489 = vmatpush3.bf16.msra.mxu1 %v778_v24  ;;  %v850_v33 = vpop.permute.xlu1 %849 }
 0x236   : > { %v779_v36 = vpack.c.bf16 %v745_v35, %v742_v32 }
 0x238   : > { %1490 = vmatprep.subr.bf16.mxu1 %v779_v36 }
 0x239   : > { %1491 = vmatpush3.bf16.msra.mxu1 %v779_v36  ;;  %v1043_v36 = vunpack.c.h.bf16 %v1834_v20 }
 0x23a   : > { %1492 = vmatprep.subr.bf16.mxu1 %v780_v34 }
 0x23d   : > { %1493 = vmatpush3.bf16.msra.mxu1 %v780_v34 }
 0x240   : > { %1495 = vmatmul.mubr.bf16.vlgmr.msra.gmra.mrb[16].mxu1 %v1609_v37 }
 0x241   : > { %1498 = vmatprep.mubr.bf16.mxu1 %v1610_v38 }
 0x248   : > { %1499 = vmatmul.mubr.bf16.gmra.mrb[20].mxu1 %v1611_v39 }
 0x249   : > { %1502 = vmatprep.mubr.bf16.mxu1 %v1612_v40  ;;  %v855_v40 = vpop.permute.xlu0 %854 }
 0x250   : > { %1503 = vmatmul.mubr.bf16.gmra.mrb[24].mxu1 %v1613_v41 }
 0x251   : > { %1506 = vmatprep.mubr.bf16.mxu1 %v1614_v42 }
 0x258   : > { %1507 = vmatmul.mubr.bf16.gmra.mrb[28].mxu1 %v1615_v43 }
 0x313   : > { %v1496_v52 = vpop.f32.mrb[16].mxu1 }
 0x314   : > { %v968_v53 = vadd.f32 %v1496_v52, %v810_v47  ;;  %v959_v55 = vpop.f32.mrb[17].mxu1 }
 0x315   : > { %v960_v58 = vadd.f32 %v959_v55, %v800_v46  ;;  %v1497_v59 = vpop.f32.mrb[18].mxu1 }
 0x316   : > { %v1024_v60 = vmax.f32 %v968_v53, 0.0  ;;  %v971_v61 = vadd.f32 %v1497_v59, %v815_v48  ;;  %v962_v63 = vpop.f32.mrb[19].mxu1  ;;  %v1048_v48 = vunpack.c.l.bf16 %v1863_v27  ;;  %v1046_v53 = vunpack.c.l.bf16 %v1855_v25 }
 0x317   : > { %v1022_v1 = vmax.f32 %v960_v58, 0.0  ;;  %v963_v2 = vadd.f32 %v962_v63, %v805_v45  ;;  %v1047_v63 = vunpack.c.h.bf16 %v1855_v25 }
 0x318   : > { %v1056_v3 = vadd.f32 %v1040_v54, %v1024_v60  ;;  %v1025_v4 = vmax.f32 %v971_v61, 0.0  ;;  %v865_v60 = vpop.permute.xlu0 %864 }
 0x319   : > { %v1054_v6 = vadd.f32 %v1038_v56, %v1022_v1  ;;  %v1023_v7 = vmax.f32 %v963_v2, 0.0 }
 0x31a   : > { %v1057_v8 = vadd.f32 %v1041_v62, %v1025_v4  ;;  %v1072_v12 = vmax.f32 %v1056_v3, 0.0 }
 0x31b   : > { %v1055_v10 = vadd.f32 %v1039_v0, %v1023_v7  ;;  %v1500_v11 = vpop.f32.mrb[20].mxu1  ;;  %v1070_v16 = vmax.f32 %v1054_v6, 0.0 }
 0x31c   : > { %v1073_v13 = vmax.f32 %v1057_v8, 0.0  ;;  %v984_v14 = vadd.f32 %v1500_v11, %v830_v51  ;;  %v975_v19 = vpop.f32.mrb[21].mxu1 }
 0x31d   : > { %v1071_v17 = vmax.f32 %v1055_v10, 0.0  ;;  %v976_v18 = vadd.f32 %v975_v19, %v820_v49  ;;  %v1501_v22 = vpop.f32.mrb[22].mxu1  ;;  %v1050_v19 = vunpack.c.l.bf16 %v1870_v29 }
 0x31e   : > { %v1028_v24 = vmax.f32 %v984_v14, 0.0  ;;  %v987_v26 = vadd.f32 %v1501_v22, %v835_v57  ;;  %v978_v30 = vpop.f32.mrb[23].mxu1  ;;  %v1091_v32 = vpack.c.bf16 %v1073_v13, %v1072_v12  ;;  %v1049_v57 = vunpack.c.h.bf16 %v1863_v27  ;;  %v875_v13 = vpop.permute.xlu0 %874 }
 0x31f   : > { %v1026_v34 = vmax.f32 %v976_v18, 0.0  ;;  %v979_v35 = vadd.f32 %v978_v30, %v825_v50  ;;  %v1090_v37 = vpack.c.bf16 %v1071_v17, %v1070_v16  ;;  %v860_v50 = vpop.permute.xlu1 %859  ;;  %v1052_v12 = vunpack.c.l.bf16 %v1877_v31 }
 0x320   : > { %v1060_v38 = vadd.f32 %v1044_v15, %v1028_v24  ;;  %v1029_v39 = vmax.f32 %v987_v26, 0.0  ;;  %v1051_v30 = vunpack.c.h.bf16 %v1870_v29  ;;  %v1617_v29 = vld [vmem:[%s2026_s5 + $0x8] sm:$0xff]  }
 0x321   : > { %v1058_v41 = vadd.f32 %v1042_v21, %v1026_v34  ;;  %v1027_v42 = vmax.f32 %v979_v35, 0.0  ;;  %1510 = vmatprep.subr.bf16.mxu0 %v1090_v37  ;;  %v1053_v21 = vunpack.c.h.bf16 %v1877_v31 }
 0x322   : > { %v1061_v43 = vadd.f32 %v1045_v28, %v1029_v39  ;;  %1511 = vmatpush3.bf16.msra.mxu0 %v1090_v37  ;;  %v1076_v23 = vmax.f32 %v1060_v38, 0.0 }
 0x323   : > { %v1059_v44 = vadd.f32 %v1043_v36, %v1027_v42  ;;  %v1504_v45 = vpop.f32.mrb[24].mxu1  ;;  %1512 = vmatprep.subr.bf16.mxu0 %v1091_v32  ;;  %v1074_v20 = vmax.f32 %v1058_v41, 0.0  ;;  %v870_v6 = vpop.permute.xlu1 %869 }
 0x324   : > { %v1077_v46 = vmax.f32 %v1061_v43, 0.0  ;;  %v1000_v47 = vadd.f32 %v1504_v45, %v850_v33  ;;  %v991_v49 = vpop.f32.mrb[25].mxu1  ;;  %v1110_v45 = vpop.permute.xlu0 %1109 }
 0x325   : > { %v1075_v51 = vmax.f32 %v1059_v44, 0.0  ;;  %v992_v52 = vadd.f32 %v991_v49, %v840_v5  ;;  %v1505_v54 = vpop.f32.mrb[26].mxu1 }
 0x326   : > { %v1032_v55 = vmax.f32 %v1000_v47, 0.0  ;;  %v1003_v56 = vadd.f32 %v1505_v54, %v855_v40  ;;  %v994_v58 = vpop.f32.mrb[27].mxu1  ;;  %1513 = vmatpush3.bf16.msra.mxu0 %v1091_v32  ;;  %v1093_v59 = vpack.c.bf16 %v1077_v46, %v1076_v23 }
 0x327   : > { %v1030_v61 = vmax.f32 %v992_v52, 0.0  ;;  %v995_v62 = vadd.f32 %v994_v58, %v845_v9  ;;  %v1092_v0 = vpack.c.bf16 %v1075_v51, %v1074_v20  ;;  %v1105_v44 = vpop.permute.xlu1 %1104 }
 0x328   : > { %v1064_v1 = vadd.f32 %v1048_v48, %v1032_v55  ;;  %v1033_v2 = vmax.f32 %v1003_v56, 0.0  ;;  %v1120_v49 = vpop.permute.xlu0 %1119 }
 0x329   : > { %v1062_v3 = vadd.f32 %v1046_v53, %v1030_v61  ;;  %v1031_v4 = vmax.f32 %v995_v62, 0.0  ;;  %1514 = vmatprep.subr.bf16.mxu0 %v1092_v0 }
 0x32a   : > { %v1065_v5 = vadd.f32 %v1049_v57, %v1033_v2  ;;  %1515 = vmatpush3.bf16.msra.mxu0 %v1092_v0  ;;  %v1080_v27 = vmax.f32 %v1064_v1, 0.0 }
 0x32b   : > { %v1063_v7 = vadd.f32 %v1047_v63, %v1031_v4  ;;  %v1508_v8 = vpop.f32.mrb[28].mxu1  ;;  %1516 = vmatprep.subr.bf16.mxu0 %v1093_v59  ;;  %v1078_v25 = vmax.f32 %v1062_v3, 0.0  ;;  %v1115_v23 = vpop.permute.xlu1 %1114 }
 0x32c   : > { %v1081_v10 = vmax.f32 %v1065_v5, 0.0  ;;  %v1016_v11 = vadd.f32 %v1508_v8, %v870_v6  ;;  %v1007_v9 = vpop.f32.mrb[29].mxu1 }
 0x32d   : > { %v1079_v14 = vmax.f32 %v1063_v7, 0.0  ;;  %v1008_v15 = vadd.f32 %v1007_v9, %v860_v50  ;;  %v1509_v16 = vpop.f32.mrb[30].mxu1 }
 0x32e   : > { %v1036_v17 = vmax.f32 %v1016_v11, 0.0  ;;  %v1019_v18 = vadd.f32 %v1509_v16, %v875_v13  ;;  %v1010_v22 = vpop.f32.mrb[31].mxu1  ;;  %1517 = vmatpush3.bf16.msra.mxu0 %v1093_v59  ;;  %v1095_v24 = vpack.c.bf16 %v1081_v10, %v1080_v27 }
 0x32f   : > { %v1034_v26 = vmax.f32 %v1008_v15, 0.0  ;;  %v1011_v28 = vadd.f32 %v1010_v22, %v865_v60  ;;  %v1094_v32 = vpack.c.bf16 %v1079_v14, %v1078_v25 }
 0x330   : > { %v1068_v33 = vadd.f32 %v1052_v12, %v1036_v17  ;;  %v1037_v34 = vmax.f32 %v1019_v18, 0.0 }
 0x331   : > { %v1066_v35 = vadd.f32 %v1050_v19, %v1034_v26  ;;  %v1035_v36 = vmax.f32 %v1011_v28, 0.0  ;;  %1518 = vmatprep.subr.bf16.mxu0 %v1094_v32 }
 0x332   : > { %v1069_v37 = vadd.f32 %v1053_v21, %v1037_v34  ;;  %1519 = vmatpush3.bf16.msra.mxu0 %v1094_v32  ;;  %v1084_v39 = vmax.f32 %v1068_v33, 0.0 }
 0x333   : > { %v1067_v38 = vadd.f32 %v1051_v30, %v1035_v36  ;;  %1520 = vmatprep.subr.bf16.mxu0 %v1095_v24  ;;  %v1082_v40 = vmax.f32 %v1066_v35, 0.0 }
 0x334   : > { %v1085_v31 = vmax.f32 %v1069_v37, 0.0 }
 0x335   : > { %v1083_v41 = vmax.f32 %v1067_v38, 0.0 }
 0x336   : > { %1521 = vmatpush3.bf16.msra.mxu0 %v1095_v24  ;;  %v1097_v42 = vpack.c.bf16 %v1085_v31, %v1084_v39 }
 0x337   : > { %v1096_v43 = vpack.c.bf16 %v1083_v41, %v1082_v40 }
 0x339   : > { %1522 = vmatprep.subr.bf16.mxu0 %v1096_v43 }
 0x33a   : > { %1523 = vmatpush3.bf16.msra.mxu0 %v1096_v43 }
 0x33b   : > { %1524 = vmatprep.subr.bf16.mxu0 %v1097_v42 }
 0x33e   : > { %1525 = vmatpush3.bf16.msra.mxu0 %v1097_v42 }
 0x341   : > { %1527 = vmatmul.mubr.bf16.vlgmr.msra.gmra.mrb[4].mxu0 %v1617_v29 }
 0x414   : > { %v1528_v46 = vpop.f32.mrb[4].mxu0 }
 0x415   : > { %v1177_v47 = vadd.f32 %v1528_v46, %v1115_v23  ;;  %v1168_v48 = vpop.f32.mrb[5].mxu0 }
 0x416   : > { %v1169_v50 = vadd.f32 %v1168_v48, %v1105_v44  ;;  %v1529_v20 = vpop.f32.mrb[6].mxu0  ;;  %1197 = sbr.rel (!%p1782_p6) target bundleno = 1061 (0x425), region = 97 }
 0x417   : > { %v1185_v51 = vmax.f32 %v1177_v47, 0.0  ;;  %v1180_v52 = vadd.f32 %v1529_v20, %v1120_v49  ;;  %v1171_v53 = vpop.f32.mrb[7].mxu0 }
 0x418   : > { %v1183_v54 = vmax.f32 %v1169_v50, 0.0  ;;  %v1172_v55 = vadd.f32 %v1171_v53, %v1110_v45 }
 0x419   : > { %1189 = vst [vmem:[%s446_s24 + $0x10] sm:$0xff] %v1185_v51  ;;  %v1186_v56 = vmax.f32 %v1180_v52, 0.0 }
 0x41a   : > { %1187 = vst [vmem:[%s446_s24] sm:$0xff] %v1183_v54  ;;  %v1184_v57 = vmax.f32 %v1172_v55, 0.0 }
 0x41b   : > { %1190 = vst [vmem:[%s446_s24 + $0x18] sm:$0xff] %v1186_v56 }
 0x41c   : > { %1188 = vst [vmem:[%s446_s24 + $0x8] sm:$0xff] %v1184_v57 }
 0x420   : > { %v1239_v60 = vld [vmem:[%s446_s24 + $0x10] sm:$0xff] }
 0x421   : > { %v1235_v58 = vld [vmem:[%s446_s24] sm:$0xff]  ;;  %1240 = vst [vmem:[%s1201_s15 + $0x20] sm:$0xff] %v1239_v60 }
 0x422   : > { %v1241_v61 = vld [vmem:[%s446_s24 + $0x18] sm:$0xff]  ;;  %1236 = vst [vmem:[%s1201_s15] sm:$0xff] %v1235_v58 }
 0x423   : > { %v1237_v59 = vld [vmem:[%s446_s24 + $0x8] sm:$0xff]  ;;  %1242 = vst [vmem:[%s1201_s15 + $0x30] sm:$0xff] %v1241_v61 }
 0x424   : > { %1238 = vst [vmem:[%s1201_s15 + $0x10] sm:$0xff] %v1237_v59 }
 0x425 PF: > { %s18_s11 = sadd.s32 1, %s1684_s11   ;;  %s2035_s27 = smov %s1664_s28 }
 0x426   : > { %p15_p13 = scmp.ge.s32.totalorder %s18_s11, 6   ;;  %s2036_s28 = smov %s1790_s20 }
 0x427   : > { %s2037_s29 = smov %s1676_s9  ;;  %s2038_s30 = smov %s1680_s10 }
 0x428   : > { %s2039_s9 = smov %s2042_s12  ;;  %s2040_s10 = smov %s2046_s13 }
 0x429   :  { %17 = sbr.rel (!%p15_p13) target bundleno = 6 (0x6), region = 172 }

</bundles_post_ra>
